<compile_context>
chip_gen: v7x
topology: tpu7x:2x2x1
jax: 0.10.0
libtpu: 0.0.40
codegen_flags: <defaults>
</compile_context>

<pallas_src>
import functools

import numpy as np
import jax
import jax.numpy as jnp
from jax import lax
from jax.experimental import pallas as pl
from jax.experimental.pallas import tpu as pltpu


# --------------------------------------------------------------------------
# Fused kernel: MLP -> per-frame fractional fft_shift + relu-magnitude
# scaling + channel mean (all in the frequency domain) -> batched windowed
# inverse-DFT matmul -> (TF, K) windowed frames (lane-dense).
# --------------------------------------------------------------------------
def _fused_kernel(h_ref, w1, b1, w2, b2, w3, b3, w4, b4, wo, bo,
                  srT_ref, siT_ref, d2t_ref, out_ref, sm_scr, ab_scr, *,
                  K, Q, TF, two_pi_over_c):
    QP = 8 * Q

    # ---- sin-activated MLP (PosEncodedUpsample net); bf16 MXU, f32 acc ----
    h = h_ref[...]                                            # (TF, D) f32
    for w, b in ((w1, b1), (w2, b2), (w3, b3), (w4, b4)):
        h = jnp.sin(jnp.dot(h.astype(jnp.bfloat16), w[...],
                            preferred_element_type=jnp.float32) + b[...])
    net = (jnp.dot(h.astype(jnp.bfloat16), wo[...],
                   preferred_element_type=jnp.float32) + bo[...])   # (TF, 2K)

    # Hoisted activations for the whole tile: fractional shift (in samples)
    # and relu magnitudes, stashed in SMEM-side... no: VMEM scratch so the
    # frame loop can read rows with a dynamic sublane index.
    sm_scr[:, :K] = (0.5 * K) * jnp.tanh(net[:, :K])          # shift
    sm_scr[:, K:] = jnp.maximum(net[:, K:], 0.0)              # magnitudes

    # Constants for this tile: filters on lanes, (padded) rfft coeffs on
    # sublanes. Rows >= C are zero (host-side padding to QP = 8*ceil(C/8)).
    srT = srT_ref[...]                                        # (QP, K)
    siT = siT_ref[...]

    # Stripe / offset ramps for the angle-addition recurrence.
    q_ramp = 8.0 * lax.broadcasted_iota(jnp.int32, (Q, 1), 0).astype(jnp.float32)
    j_ramp = lax.broadcasted_iota(jnp.int32, (8, 1), 0).astype(jnp.float32)
    dn = (((1,), (1,)), ((), ()))                             # contract lane dims

    def frame_body(f, carry):
        sm = sm_scr[pl.ds(f, 1), :]                           # (1, 2K)
        shift = sm[:, :K]                                     # (1, K)
        m = sm[:, K:]                                         # (1, K)
        delta = two_pi_over_c * shift                         # (1, K)

        # EUP only on the stripe (c = 8q) and the offset table (c = j);
        # the full (QP, K) cos/sin grid comes from the exact identity
        # cos((8q+j)*delta) = cq*cj - sq*sj  (VALU work, f32).
        thq = q_ramp * delta                                  # (Q, K)
        thj = j_ramp * delta                                  # (8, K)
        cq, sq = jnp.cos(thq), jnp.sin(thq)
        cj, sj = jnp.cos(thj), jnp.sin(thj)
        ct = (cq[:, None, :] * cj[None, :, :]
              - sq[:, None, :] * sj[None, :, :]).reshape(QP, K)
        st = (sq[:, None, :] * cj[None, :, :]
              + cq[:, None, :] * sj[None, :, :]).reshape(QP, K)

        # Shifted spectrum; the relu magnitude and the mean over the K filter
        # channels are folded into one MXU matvec whose result is already a
        # lane-dense row (no sublane->lane relayout, no column stores).
        a_row = lax.dot_general(m, srT * ct + siT * st, dn,
                                preferred_element_type=jnp.float32)   # (1, QP)
        b_row = lax.dot_general(m, siT * ct - srT * st, dn,
                                preferred_element_type=jnp.float32)   # (1, QP)
        ab_scr[pl.ds(f, 1), :] = jnp.concatenate([a_row, b_row], axis=1)
        return carry

    lax.fori_loop(0, TF, frame_body, 0)

    # One batched, windowed inverse-rDFT matmul for the whole tile:
    #   (TF, 2*QP) @ (2*QP, K) -> (TF, K)   (Hann window and the 1/n_filters
    # channel mean are folded into d2t host-side).  Lane-dense store.
    out_ref[...] = jnp.dot(ab_scr[...], d2t_ref[...],
                           preferred_element_type=jnp.float32)


def fused_forward(h0, mlp_params, srTp, siTp, d2t, *, K, C, Q, hop,
                  frames_per_step):
    F, D = h0.shape
    TF = frames_per_step
    assert F % TF == 0
    n_steps = F // TF
    QP = 8 * Q

    kern = functools.partial(_fused_kernel, K=K, Q=Q, TF=TF,
                             two_pi_over_c=2.0 * np.pi / C)
    const2d = lambda t: (0, 0)
    param_specs = [pl.BlockSpec(p.shape, const2d) for p in mlp_params]

    frames = pl.pallas_call(
        kern,
        out_shape=jax.ShapeDtypeStruct((F, K), jnp.float32),
        grid=(n_steps,),
        in_specs=(
            [pl.BlockSpec((TF, D), lambda t: (t, 0))]          # MLP input rows
            + param_specs                                      # 10 weights/biases
            + [pl.BlockSpec((QP, K), const2d),                 # Re rfft(fb).T (padded)
               pl.BlockSpec((QP, K), const2d),                 # Im rfft(fb).T (padded)
               pl.BlockSpec((2 * QP, K), const2d)]             # windowed iDFT matrix
        ),
        out_specs=pl.BlockSpec((TF, K), lambda t: (t, 0)),     # lane-dense frames
        scratch_shapes=[pltpu.VMEM((TF, 2 * K), jnp.float32),  # shift | magnitudes
                        pltpu.VMEM((TF, 2 * QP), jnp.float32)],  # a | b rows
        compiler_params=pltpu.CompilerParams(
            dimension_semantics=("parallel",)),
    )(h0, *mlp_params, srTp, siTp, d2t)

    # hop overlap-add in plain JAX on the (F, K) windowed frames (keeps the
    # frame-tile grid axis parallel; one tiny (F, K) pass).
    first = frames[:, :hop]
    second = jnp.concatenate(
        [jnp.zeros((1, hop), jnp.float32), frames[:-1, hop:]], axis=0)
    return (first + second).reshape(1, 1, F * hop)


# --------------------------------------------------------------------------
# plain-JAX / numpy glue: constants, pos encodings, parameters
# --------------------------------------------------------------------------
def make_filter_bank(n_filters, kernel_size):
    """Deterministic morlet-ish real filterbank, shape (n_filters, kernel_size)."""
    n = np.arange(kernel_size)
    freqs = np.linspace(0.01, 0.45, n_filters)
    t = (n - kernel_size / 2.0) / (kernel_size / 2.0)
    env = np.exp(-((t * 4.0) ** 2) / 2.0)
    fb = np.cos(2.0 * np.pi * freqs[:, None] * n[None, :]) * env[None, :]
    return fb.astype(np.float32)


def irfft_matrices(K):
    """CosM/SinM of shape (C, K) implementing irfft(., n=K, norm='ortho')."""
    C = K // 2 + 1
    n = np.arange(K)
    k = np.arange(C)
    ang = 2.0 * np.pi * np.outer(k, n) / K
    scale = np.full((C, 1), 2.0)
    scale[0, 0] = 1.0
    scale[-1, 0] = 1.0
    scale = scale / np.sqrt(K)
    return ((np.cos(ang) * scale).astype(np.float32),
            (np.sin(ang) * scale).astype(np.float32))


def pos_encoded(time_dim, n_freqs):
    x = np.linspace(-np.pi, np.pi, time_dim)[:, None]
    feats = [x]
    for i in range(n_freqs):
        feats.append(np.sin((2 ** i) * x))
        feats.append(np.cos((2 ** i) * x))
    return jnp.asarray(np.concatenate(feats, axis=-1), dtype=jnp.float32)


def _uniform(key, shape, w=0.1):
    return jax.random.uniform(key, shape, jnp.float32, -w, w)


class Model:
    def __init__(self, key, *, model_dim, n_frames, kernel_size, n_freqs=8,
                 frames_per_step=8):
        self.D = model_dim
        self.F = n_frames
        self.K = kernel_size            # kernel_size == n_filters in the original
        self.C = kernel_size // 2 + 1
        self.Q = (self.C + 7) // 8      # sublane-stripe count for the recurrence
        self.QP = 8 * self.Q            # padded coefficient rows
        self.hop = kernel_size // 2
        self.n_samples = self.F * self.hop
        self.TF = min(frames_per_step, self.F)
        assert self.F % self.TF == 0

        keys = jax.random.split(key, 16)
        # latent buffer ~ N(0, 1), shape (1, model_dim)
        self.latent = jax.random.normal(keys[0], (1, self.D), jnp.float32)

        # fixed filterbank buffer + its precomputed ortho rfft
        fb = make_filter_bank(self.K, self.K)
        spec = np.fft.rfft(fb, norm="ortho")
        Sr = spec.real.astype(np.float32)                   # (K, C)
        Si = spec.imag.astype(np.float32)
        self.Sr = jnp.asarray(Sr)                           # reference layout
        self.Si = jnp.asarray(Si)
        SrTp = np.zeros((self.QP, self.K), np.float32)      # kernel layout, padded
        SiTp = np.zeros((self.QP, self.K), np.float32)
        SrTp[:self.C] = Sr.T
        SiTp[:self.C] = Si.T
        self.SrTp = jnp.asarray(SrTp)
        self.SiTp = jnp.asarray(SiTp)

        CosM, SinM = irfft_matrices(self.K)                 # (C, K) each
        self.CosM = jnp.asarray(CosM)
        self.SinM = jnp.asarray(SinM)

        # Hann window (torch.hann_window default: periodic).
        n = np.arange(self.K)
        win = (0.5 * (1.0 - np.cos(2.0 * np.pi * n / self.K))).astype(np.float32)
        self.win = jnp.asarray(win).reshape(1, self.K)

        # Stacked, windowed, mean-scaled inverse-DFT matrix for the kernel:
        #   frames = [a | b] @ D2T, rows C..QP-1 and QP+C..2QP-1 are zero
        # (they meet the zero-padded srT/siT rows), window and 1/n_filters
        # channel mean folded in.
        inv_nch = 1.0 / self.K
        d2t = np.zeros((2 * self.QP, self.K), np.float32)
        d2t[:self.C] = CosM * win[None, :] * inv_nch
        d2t[self.QP:self.QP + self.C] = -SinM * win[None, :] * inv_nch
        self.D2T = jnp.asarray(d2t)

        # PosEncodedUpsample parameters (multiply=True, layers=4, sin act).
        self.pos_feats = pos_encoded(self.F, n_freqs)        # (F, 2*n_freqs+1)
        pdim = self.pos_feats.shape[1]
        out_ch = 2 * self.K                                  # 1024 in the original
        self.W_ep = _uniform(keys[1], (pdim, self.D))
        self.b_ep = jnp.zeros((1, self.D), jnp.float32)
        self.W_el = _uniform(keys[2], (self.D, self.D))
        self.b_el = jnp.zeros((1, self.D), jnp.float32)
        mlp = []
        for i in range(4):
            mlp.append(_uniform(keys[3 + i], (self.D, self.D)).astype(jnp.bfloat16))
            mlp.append(jnp.zeros((1, self.D), jnp.float32))
        mlp.append(_uniform(keys[8], (self.D, out_ch)).astype(jnp.bfloat16))
        mlp.append(jnp.zeros((1, out_ch), jnp.float32))
        self.mlp_params = tuple(mlp)       # weights pre-cast to bf16, biases f32

    # ---- net input (PosEncodedUpsample embedding, simplified) ----------------
    def _net_input(self):
        h_pos = jnp.sin(self.pos_feats @ self.W_ep + self.b_ep)   # (F, D)
        h_lat = jnp.sin(self.latent @ self.W_el + self.b_el)      # (1, D)
        return h_pos * h_lat                                      # multiply=True

    def forward(self, x):
        # `x` is unused, exactly like the torch forward.
        del x
        return fused_forward(self._net_input(), self.mlp_params,
                             self.SrTp, self.SiTp, self.D2T,
                             K=self.K, C=self.C, Q=self.Q, hop=self.hop,
                             frames_per_step=self.TF)

    # ---- pure-jnp reference (direct math, no Pallas, no recurrence) ----------
    def reference_forward(self, x):
        del x
        F, K, C, hop = self.F, self.K, self.C, self.hop
        h = self._net_input()
        w1, b1, w2, b2, w3, b3, w4, b4, wo, bo = self.mlp_params
        for w, b in ((w1, b1), (w2, b2), (w3, b3), (w4, b4)):
            h = jnp.sin(jnp.dot(h.astype(jnp.bfloat16), w,
                                preferred_element_type=jnp.float32) + b)
        net_out = jnp.dot(h.astype(jnp.bfloat16), wo,
                          preferred_element_type=jnp.float32) + bo   # (F, 2K)
        p = jnp.tanh(net_out[:, :K])                               # (F, K)
        m = jnp.maximum(net_out[:, K:], 0.0)                       # (F, K)
        shift = 0.5 * K * p
        kramp = (2.0 * jnp.pi / C) * jnp.arange(C, dtype=jnp.float32)
        theta = shift[..., None] * kramp                           # (F, K, C)
        ct, st = jnp.cos(theta), jnp.sin(theta)
        A = m[..., None] * (self.Sr * ct + self.Si * st)
        B = m[..., None] * (self.Si * ct - self.Sr * st)
        a = A.sum(axis=1)                                          # (F, C)
        b = B.sum(axis=1)
        frames = (a @ self.CosM - b @ self.SinM) * self.win * (1.0 / K)  # (F, K)
        first = frames[:, :hop]
        second = jnp.concatenate(
            [jnp.zeros((1, hop), jnp.float32), frames[:-1, hop:]], axis=0)
        return (first + second).reshape(1, 1, F * hop)


# --------------------------------------------------------------------------
if __name__ == "__main__":
    # Small shapes consistent with the module structure:
    #   model_dim=32, n_frames=16, kernel_size(=n_filters)=128
    #   -> MLP out_channels = 2*K = 256, hop = 64, n_samples = 1024
    # frames_per_step=8 -> a 2-step parallel grid (v7x megacore friendly).
    D, F, K = 32, 16, 128
    key = jax.random.PRNGKey(0)
    model = Model(key, model_dim=D, n_frames=F, kernel_size=K, n_freqs=8,
                  frames_per_step=8)

    # forward() ignores x (as in the torch module); provide a dummy anyway.
    x_in = jax.random.normal(jax.random.fold_in(key, 123), (1, D), jnp.float32)

    out = jax.block_until_ready(model.forward(x_in))
    assert out.shape == (1, 1, F * (K // 2)), out.shape

    ref = jax.block_until_ready(model.reference_forward(x_in))
    err = float(jnp.max(jnp.abs(out - ref)))
    assert err < 5e-3, f"mismatch vs reference: {err}"

    print("KERNEL_OK")
</pallas_src>

<mosaic_0001>
module attributes {stable_mosaic.version = 11 : i64} {
  func.func @_fused_kernel(%arg0: i32, %arg1: memref<8x32xf32, #tpu.memory_space<vmem>>, %arg2: memref<32x32xbf16, #tpu.memory_space<vmem>>, %arg3: memref<1x32xf32, #tpu.memory_space<vmem>>, %arg4: memref<32x32xbf16, #tpu.memory_space<vmem>>, %arg5: memref<1x32xf32, #tpu.memory_space<vmem>>, %arg6: memref<32x32xbf16, #tpu.memory_space<vmem>>, %arg7: memref<1x32xf32, #tpu.memory_space<vmem>>, %arg8: memref<32x32xbf16, #tpu.memory_space<vmem>>, %arg9: memref<1x32xf32, #tpu.memory_space<vmem>>, %arg10: memref<32x256xbf16, #tpu.memory_space<vmem>>, %arg11: memref<1x256xf32, #tpu.memory_space<vmem>>, %arg12: memref<72x128xf32, #tpu.memory_space<vmem>>, %arg13: memref<72x128xf32, #tpu.memory_space<vmem>>, %arg14: memref<144x128xf32, #tpu.memory_space<vmem>>, %arg15: memref<8x128xf32, #tpu.memory_space<vmem>>, %arg16: memref<8x256xf32, #tpu.memory_space<vmem>>, %arg17: memref<8x144xf32, #tpu.memory_space<vmem>>) attributes {dimension_semantics = [#tpu.dimension_semantics<parallel>], iteration_bounds = array<i64: 2>, scalar_prefetch = 0 : i64, scratch_operands = 2 : i64, tpu.core_type = #tpu.core_type<tc>, window_params = [{transform_indices = @transform_0, window_bounds = array<i64: 8, 32>}, {pipeline_mode = #tpu.pipeline_mode<synchronous>, transform_indices = @transform_1, window_bounds = array<i64: 32, 32>}, {pipeline_mode = #tpu.pipeline_mode<synchronous>, transform_indices = @transform_2, window_bounds = array<i64: 1, 32>}, {pipeline_mode = #tpu.pipeline_mode<synchronous>, transform_indices = @transform_3, window_bounds = array<i64: 32, 32>}, {pipeline_mode = #tpu.pipeline_mode<synchronous>, transform_indices = @transform_4, window_bounds = array<i64: 1, 32>}, {pipeline_mode = #tpu.pipeline_mode<synchronous>, transform_indices = @transform_5, window_bounds = array<i64: 32, 32>}, {pipeline_mode = #tpu.pipeline_mode<synchronous>, transform_indices = @transform_6, window_bounds = array<i64: 1, 32>}, {pipeline_mode = #tpu.pipeline_mode<synchronous>, transform_indices = @transform_7, window_bounds = array<i64: 32, 32>}, {pipeline_mode = #tpu.pipeline_mode<synchronous>, transform_indices = @transform_8, window_bounds = array<i64: 1, 32>}, {pipeline_mode = #tpu.pipeline_mode<synchronous>, transform_indices = @transform_9, window_bounds = array<i64: 32, 256>}, {pipeline_mode = #tpu.pipeline_mode<synchronous>, transform_indices = @transform_10, window_bounds = array<i64: 1, 256>}, {pipeline_mode = #tpu.pipeline_mode<synchronous>, transform_indices = @transform_11, window_bounds = array<i64: 72, 128>}, {pipeline_mode = #tpu.pipeline_mode<synchronous>, transform_indices = @transform_12, window_bounds = array<i64: 72, 128>}, {pipeline_mode = #tpu.pipeline_mode<synchronous>, transform_indices = @transform_13, window_bounds = array<i64: 144, 128>}, {transform_indices = @transform_14, window_bounds = array<i64: 8, 128>}]} {
    %c0 = arith.constant 0 : index
    %c0_0 = arith.constant 0 : index
    %0 = vector.load %arg1[%c0, %c0_0] : memref<8x32xf32, #tpu.memory_space<vmem>>, vector<8x32xf32>
    %1 = arith.truncf %0 : vector<8x32xf32> to vector<8x32xbf16>
    %c0_1 = arith.constant 0 : index
    %c0_2 = arith.constant 0 : index
    %2 = vector.load %arg2[%c0_1, %c0_2] : memref<32x32xbf16, #tpu.memory_space<vmem>>, vector<32x32xbf16>
    %cst = arith.constant dense<0.000000e+00> : vector<8x32xf32>
    %3 = tpu.matmul %1, %2, %cst {dimension_numbers = #tpu.dot_dimension_numbers<[1], [0], [0], [1], [0, 0, 1, 1], [], []>} : vector<8x32xbf16>, vector<32x32xbf16>, vector<8x32xf32> -> vector<8x32xf32>
    %c0_3 = arith.constant 0 : index
    %c0_4 = arith.constant 0 : index
    %4 = vector.load %arg3[%c0_3, %c0_4] : memref<1x32xf32, #tpu.memory_space<vmem>>, vector<1x32xf32>
    %5 = vector.broadcast %4 : vector<1x32xf32> to vector<8x32xf32>
    %6 = arith.addf %3, %5 : vector<8x32xf32>
    %7 = math.sin %6 : vector<8x32xf32>
    %8 = arith.truncf %7 : vector<8x32xf32> to vector<8x32xbf16>
    %c0_5 = arith.constant 0 : index
    %c0_6 = arith.constant 0 : index
    %9 = vector.load %arg4[%c0_5, %c0_6] : memref<32x32xbf16, #tpu.memory_space<vmem>>, vector<32x32xbf16>
    %cst_7 = arith.constant dense<0.000000e+00> : vector<8x32xf32>
    %10 = tpu.matmul %8, %9, %cst_7 {dimension_numbers = #tpu.dot_dimension_numbers<[1], [0], [0], [1], [0, 0, 1, 1], [], []>} : vector<8x32xbf16>, vector<32x32xbf16>, vector<8x32xf32> -> vector<8x32xf32>
    %c0_8 = arith.constant 0 : index
    %c0_9 = arith.constant 0 : index
    %11 = vector.load %arg5[%c0_8, %c0_9] : memref<1x32xf32, #tpu.memory_space<vmem>>, vector<1x32xf32>
    %12 = vector.broadcast %11 : vector<1x32xf32> to vector<8x32xf32>
    %13 = arith.addf %10, %12 : vector<8x32xf32>
    %14 = math.sin %13 : vector<8x32xf32>
    %15 = arith.truncf %14 : vector<8x32xf32> to vector<8x32xbf16>
    %c0_10 = arith.constant 0 : index
    %c0_11 = arith.constant 0 : index
    %16 = vector.load %arg6[%c0_10, %c0_11] : memref<32x32xbf16, #tpu.memory_space<vmem>>, vector<32x32xbf16>
    %cst_12 = arith.constant dense<0.000000e+00> : vector<8x32xf32>
    %17 = tpu.matmul %15, %16, %cst_12 {dimension_numbers = #tpu.dot_dimension_numbers<[1], [0], [0], [1], [0, 0, 1, 1], [], []>} : vector<8x32xbf16>, vector<32x32xbf16>, vector<8x32xf32> -> vector<8x32xf32>
    %c0_13 = arith.constant 0 : index
    %c0_14 = arith.constant 0 : index
    %18 = vector.load %arg7[%c0_13, %c0_14] : memref<1x32xf32, #tpu.memory_space<vmem>>, vector<1x32xf32>
    %19 = vector.broadcast %18 : vector<1x32xf32> to vector<8x32xf32>
    %20 = arith.addf %17, %19 : vector<8x32xf32>
    %21 = math.sin %20 : vector<8x32xf32>
    %22 = arith.truncf %21 : vector<8x32xf32> to vector<8x32xbf16>
    %c0_15 = arith.constant 0 : index
    %c0_16 = arith.constant 0 : index
    %23 = vector.load %arg8[%c0_15, %c0_16] : memref<32x32xbf16, #tpu.memory_space<vmem>>, vector<32x32xbf16>
    %cst_17 = arith.constant dense<0.000000e+00> : vector<8x32xf32>
    %24 = tpu.matmul %22, %23, %cst_17 {dimension_numbers = #tpu.dot_dimension_numbers<[1], [0], [0], [1], [0, 0, 1, 1], [], []>} : vector<8x32xbf16>, vector<32x32xbf16>, vector<8x32xf32> -> vector<8x32xf32>
    %c0_18 = arith.constant 0 : index
    %c0_19 = arith.constant 0 : index
    %25 = vector.load %arg9[%c0_18, %c0_19] : memref<1x32xf32, #tpu.memory_space<vmem>>, vector<1x32xf32>
    %26 = vector.broadcast %25 : vector<1x32xf32> to vector<8x32xf32>
    %27 = arith.addf %24, %26 : vector<8x32xf32>
    %28 = math.sin %27 : vector<8x32xf32>
    %29 = arith.truncf %28 : vector<8x32xf32> to vector<8x32xbf16>
    %c0_20 = arith.constant 0 : index
    %c0_21 = arith.constant 0 : index
    %30 = vector.load %arg10[%c0_20, %c0_21] : memref<32x256xbf16, #tpu.memory_space<vmem>>, vector<32x256xbf16>
    %cst_22 = arith.constant dense<0.000000e+00> : vector<8x256xf32>
    %31 = tpu.matmul %29, %30, %cst_22 {dimension_numbers = #tpu.dot_dimension_numbers<[1], [0], [0], [1], [0, 0, 1, 1], [], []>} : vector<8x32xbf16>, vector<32x256xbf16>, vector<8x256xf32> -> vector<8x256xf32>
    %c0_23 = arith.constant 0 : index
    %c0_24 = arith.constant 0 : index
    %32 = vector.load %arg11[%c0_23, %c0_24] : memref<1x256xf32, #tpu.memory_space<vmem>>, vector<1x256xf32>
    %33 = vector.broadcast %32 : vector<1x256xf32> to vector<8x256xf32>
    %34 = arith.addf %31, %33 : vector<8x256xf32>
    %35 = vector.extract_strided_slice %34 {offsets = [0, 0], sizes = [8, 128], strides = [1, 1]} : vector<8x256xf32> to vector<8x128xf32>
    %36 = math.tanh %35 : vector<8x128xf32>
    %cst_25 = arith.constant 6.400000e+01 : f32
    %37 = vector.broadcast %cst_25 : f32 to vector<8x128xf32>
    %38 = arith.mulf %37, %36 : vector<8x128xf32>
    %c0_26 = arith.constant 0 : index
    %c0_27 = arith.constant 0 : index
    %39 = vector.load %arg16[%c0_26, %c0_27] : memref<8x256xf32, #tpu.memory_space<vmem>>, vector<8x128xf32>
    tpu.vector_store %arg16[%c0_26, %c0_27], %38 {strides = array<i32>} : memref<8x256xf32, #tpu.memory_space<vmem>>, vector<8x128xf32>,
    %40 = vector.extract_strided_slice %34 {offsets = [0, 128], sizes = [8, 128], strides = [1, 1]} : vector<8x256xf32> to vector<8x128xf32>
    %cst_28 = arith.constant 0.000000e+00 : f32
    %41 = vector.broadcast %cst_28 : f32 to vector<8x128xf32>
    %42 = arith.maximumf %40, %41 : vector<8x128xf32>
    %c0_29 = arith.constant 0 : index
    %c128 = arith.constant 128 : index
    %43 = vector.load %arg16[%c0_29, %c128] : memref<8x256xf32, #tpu.memory_space<vmem>>, vector<8x128xf32>
    tpu.vector_store %arg16[%c0_29, %c128], %42 {strides = array<i32>} : memref<8x256xf32, #tpu.memory_space<vmem>>, vector<8x128xf32>,
    %c0_30 = arith.constant 0 : index
    %c0_31 = arith.constant 0 : index
    %44 = vector.load %arg12[%c0_30, %c0_31] : memref<72x128xf32, #tpu.memory_space<vmem>>, vector<72x128xf32>
    %c0_32 = arith.constant 0 : index
    %c0_33 = arith.constant 0 : index
    %45 = vector.load %arg13[%c0_32, %c0_33] : memref<72x128xf32, #tpu.memory_space<vmem>>, vector<72x128xf32>
    %46 = tpu.iota {dimensions = array<i32: 0>} : vector<9x1xi32>
    %47 = arith.sitofp %46 : vector<9x1xi32> to vector<9x1xf32>
    %cst_34 = arith.constant 8.000000e+00 : f32
    %48 = vector.broadcast %cst_34 : f32 to vector<9x1xf32>
    %49 = arith.mulf %48, %47 : vector<9x1xf32>
    %50 = tpu.iota {dimensions = array<i32: 0>} : vector<8x1xi32>
    %51 = arith.sitofp %50 : vector<8x1xi32> to vector<8x1xf32>
    %c0_i32 = arith.constant 0 : i32
    %c8_i32 = arith.constant 8 : i32
    %52 = arith.addi %c0_i32, %c8_i32 : i32
    %c1_i32 = arith.constant 1 : i32
    scf.for %arg18 = %c0_i32 to %52 step %c1_i32  : i32 {
      %57 = arith.index_cast %arg18 : i32 to index
      %c0_43 = arith.constant 0 : index
      %58 = vector.load %arg16[%57, %c0_43] : memref<8x256xf32, #tpu.memory_space<vmem>>, vector<1x256xf32>
      %59 = vector.extract_strided_slice %58 {offsets = [0, 0], sizes = [1, 128], strides = [1, 1]} : vector<1x256xf32> to vector<1x128xf32>
      %60 = vector.extract_strided_slice %58 {offsets = [0, 128], sizes = [1, 128], strides = [1, 1]} : vector<1x256xf32> to vector<1x128xf32>
      %cst_44 = arith.constant 0.0966643914 : f32
      %61 = vector.broadcast %cst_44 : f32 to vector<1x128xf32>
      %62 = arith.mulf %61, %59 : vector<1x128xf32>
      %63 = vector.broadcast %49 : vector<9x1xf32> to vector<9x128xf32>
      %64 = vector.broadcast %62 : vector<1x128xf32> to vector<9x128xf32>
      %65 = arith.mulf %63, %64 : vector<9x128xf32>
      %66 = vector.broadcast %51 : vector<8x1xf32> to vector<8x128xf32>
      %67 = vector.broadcast %62 : vector<1x128xf32> to vector<8x128xf32>
      %68 = arith.mulf %66, %67 : vector<8x128xf32>
      %69 = math.cos %65 : vector<9x128xf32>
      %70 = math.sin %65 : vector<9x128xf32>
      %71 = math.cos %68 : vector<8x128xf32>
      %72 = math.sin %68 : vector<8x128xf32>
      %73 = vector.shape_cast %69 : vector<9x128xf32> to vector<9x1x128xf32>
      %74 = vector.shape_cast %71 : vector<8x128xf32> to vector<1x8x128xf32>
      %75 = vector.broadcast %73 : vector<9x1x128xf32> to vector<9x8x128xf32>
      %76 = vector.broadcast %74 : vector<1x8x128xf32> to vector<9x8x128xf32>
      %77 = arith.mulf %75, %76 : vector<9x8x128xf32>
      %78 = vector.shape_cast %70 : vector<9x128xf32> to vector<9x1x128xf32>
      %79 = vector.shape_cast %72 : vector<8x128xf32> to vector<1x8x128xf32>
      %80 = vector.broadcast %78 : vector<9x1x128xf32> to vector<9x8x128xf32>
      %81 = vector.broadcast %79 : vector<1x8x128xf32> to vector<9x8x128xf32>
      %82 = arith.mulf %80, %81 : vector<9x8x128xf32>
      %83 = arith.subf %77, %82 : vector<9x8x128xf32>
      %84 = vector.shape_cast %83 : vector<9x8x128xf32> to vector<72x128xf32>
      %85 = vector.shape_cast %70 : vector<9x128xf32> to vector<9x1x128xf32>
      %86 = vector.shape_cast %71 : vector<8x128xf32> to vector<1x8x128xf32>
      %87 = vector.broadcast %85 : vector<9x1x128xf32> to vector<9x8x128xf32>
      %88 = vector.broadcast %86 : vector<1x8x128xf32> to vector<9x8x128xf32>
      %89 = arith.mulf %87, %88 : vector<9x8x128xf32>
      %90 = vector.shape_cast %69 : vector<9x128xf32> to vector<9x1x128xf32>
      %91 = vector.shape_cast %72 : vector<8x128xf32> to vector<1x8x128xf32>
      %92 = vector.broadcast %90 : vector<9x1x128xf32> to vector<9x8x128xf32>
      %93 = vector.broadcast %91 : vector<1x8x128xf32> to vector<9x8x128xf32>
      %94 = arith.mulf %92, %93 : vector<9x8x128xf32>
      %95 = arith.addf %89, %94 : vector<9x8x128xf32>
      %96 = vector.shape_cast %95 : vector<9x8x128xf32> to vector<72x128xf32>
      %97 = arith.mulf %44, %84 : vector<72x128xf32>
      %98 = arith.mulf %45, %96 : vector<72x128xf32>
      %99 = arith.addf %97, %98 : vector<72x128xf32>
      %cst_45 = arith.constant dense<0.000000e+00> : vector<1x72xf32>
      %100 = tpu.matmul %60, %99, %cst_45 {dimension_numbers = #tpu.dot_dimension_numbers<[1], [1], [0], [0], [0, 0, 1, 0], [], []>} : vector<1x128xf32>, vector<72x128xf32>, vector<1x72xf32> -> vector<1x72xf32>
      %101 = arith.mulf %45, %84 : vector<72x128xf32>
      %102 = arith.mulf %44, %96 : vector<72x128xf32>
      %103 = arith.subf %101, %102 : vector<72x128xf32>
      %cst_46 = arith.constant dense<0.000000e+00> : vector<1x72xf32>
      %104 = tpu.matmul %60, %103, %cst_46 {dimension_numbers = #tpu.dot_dimension_numbers<[1], [1], [0], [0], [0, 0, 1, 0], [], []>} : vector<1x128xf32>, vector<72x128xf32>, vector<1x72xf32> -> vector<1x72xf32>
      %105 = tpu.concatenate %100, %104 in 1 : vector<1x72xf32>, vector<1x72xf32> -> vector<1x144xf32>
      %106 = arith.index_cast %arg18 : i32 to index
      %c0_47 = arith.constant 0 : index
      %107 = vector.load %arg17[%106, %c0_47] : memref<8x144xf32, #tpu.memory_space<vmem>>, vector<1x144xf32>
      tpu.vector_store %arg17[%106, %c0_47], %105 {strides = array<i32>} : memref<8x144xf32, #tpu.memory_space<vmem>>, vector<1x144xf32>,
    }
    %c8_i32_35 = arith.constant 8 : i32
    %c0_36 = arith.constant 0 : index
    %c0_37 = arith.constant 0 : index
    %53 = vector.load %arg17[%c0_36, %c0_37] : memref<8x144xf32, #tpu.memory_space<vmem>>, vector<8x144xf32>
    %c0_38 = arith.constant 0 : index
    %c0_39 = arith.constant 0 : index
    %54 = vector.load %arg14[%c0_38, %c0_39] : memref<144x128xf32, #tpu.memory_space<vmem>>, vector<144x128xf32>
    %cst_40 = arith.constant dense<0.000000e+00> : vector<8x128xf32>
    %55 = tpu.matmul %53, %54, %cst_40 {dimension_numbers = #tpu.dot_dimension_numbers<[1], [0], [0], [1], [0, 0, 1, 1], [], []>} : vector<8x144xf32>, vector<144x128xf32>, vector<8x128xf32> -> vector<8x128xf32>
    %c0_41 = arith.constant 0 : index
    %c0_42 = arith.constant 0 : index
    %56 = vector.load %arg15[%c0_41, %c0_42] : memref<8x128xf32, #tpu.memory_space<vmem>>, vector<8x128xf32>
    tpu.vector_store %arg15[%c0_41, %c0_42], %55 {strides = array<i32>} : memref<8x128xf32, #tpu.memory_space<vmem>>, vector<8x128xf32>,
    return
  }
  func.func @transform_0(%arg0: i32) -> (i32, i32) {
    %c0_i32 = arith.constant 0 : i32
    %c0_i32_0 = arith.constant 0 : i32
    return %arg0, %c0_i32 : i32, i32
  }
  func.func @transform_1(%arg0: i32) -> (i32, i32) {
    %c0_i32 = arith.constant 0 : i32
    %c0_i32_0 = arith.constant 0 : i32
    %c0_i32_1 = arith.constant 0 : i32
    return %c0_i32, %c0_i32_0 : i32, i32
  }
  func.func @transform_2(%arg0: i32) -> (i32, i32) {
    %c0_i32 = arith.constant 0 : i32
    %c0_i32_0 = arith.constant 0 : i32
    %c0_i32_1 = arith.constant 0 : i32
    return %c0_i32, %c0_i32_0 : i32, i32
  }
  func.func @transform_3(%arg0: i32) -> (i32, i32) {
    %c0_i32 = arith.constant 0 : i32
    %c0_i32_0 = arith.constant 0 : i32
    %c0_i32_1 = arith.constant 0 : i32
    return %c0_i32, %c0_i32_0 : i32, i32
  }
  func.func @transform_4(%arg0: i32) -> (i32, i32) {
    %c0_i32 = arith.constant 0 : i32
    %c0_i32_0 = arith.constant 0 : i32
    %c0_i32_1 = arith.constant 0 : i32
    return %c0_i32, %c0_i32_0 : i32, i32
  }
  func.func @transform_5(%arg0: i32) -> (i32, i32) {
    %c0_i32 = arith.constant 0 : i32
    %c0_i32_0 = arith.constant 0 : i32
    %c0_i32_1 = arith.constant 0 : i32
    return %c0_i32, %c0_i32_0 : i32, i32
  }
  func.func @transform_6(%arg0: i32) -> (i32, i32) {
    %c0_i32 = arith.constant 0 : i32
    %c0_i32_0 = arith.constant 0 : i32
    %c0_i32_1 = arith.constant 0 : i32
    return %c0_i32, %c0_i32_0 : i32, i32
  }
  func.func @transform_7(%arg0: i32) -> (i32, i32) {
    %c0_i32 = arith.constant 0 : i32
    %c0_i32_0 = arith.constant 0 : i32
    %c0_i32_1 = arith.constant 0 : i32
    return %c0_i32, %c0_i32_0 : i32, i32
  }
  func.func @transform_8(%arg0: i32) -> (i32, i32) {
    %c0_i32 = arith.constant 0 : i32
    %c0_i32_0 = arith.constant 0 : i32
    %c0_i32_1 = arith.constant 0 : i32
    return %c0_i32, %c0_i32_0 : i32, i32
  }
  func.func @transform_9(%arg0: i32) -> (i32, i32) {
    %c0_i32 = arith.constant 0 : i32
    %c0_i32_0 = arith.constant 0 : i32
    %c0_i32_1 = arith.constant 0 : i32
    return %c0_i32, %c0_i32_0 : i32, i32
  }
  func.func @transform_10(%arg0: i32) -> (i32, i32) {
    %c0_i32 = arith.constant 0 : i32
    %c0_i32_0 = arith.constant 0 : i32
    %c0_i32_1 = arith.constant 0 : i32
    return %c0_i32, %c0_i32_0 : i32, i32
  }
  func.func @transform_11(%arg0: i32) -> (i32, i32) {
    %c0_i32 = arith.constant 0 : i32
    %c0_i32_0 = arith.constant 0 : i32
    %c0_i32_1 = arith.constant 0 : i32
    return %c0_i32, %c0_i32_0 : i32, i32
  }
  func.func @transform_12(%arg0: i32) -> (i32, i32) {
    %c0_i32 = arith.constant 0 : i32
    %c0_i32_0 = arith.constant 0 : i32
    %c0_i32_1 = arith.constant 0 : i32
    return %c0_i32, %c0_i32_0 : i32, i32
  }
  func.func @transform_13(%arg0: i32) -> (i32, i32) {
    %c0_i32 = arith.constant 0 : i32
    %c0_i32_0 = arith.constant 0 : i32
    %c0_i32_1 = arith.constant 0 : i32
    return %c0_i32, %c0_i32_0 : i32, i32
  }
  func.func @transform_14(%arg0: i32) -> (i32, i32) {
    %c0_i32 = arith.constant 0 : i32
    %c0_i32_0 = arith.constant 0 : i32
    return %arg0, %c0_i32 : i32, i32
  }
}

</mosaic_0001>

<bundles_post_ra>
// kernel: tpu_custom_call.1
= control target key start
LH: loop header
LB: loop body
LE: loop exit
PB: predicated region body
PF: predicated region fallthrough
CT: control target
= control target key end

     0   :  { %s5031_s0 = inlined_call_operand.hbm [shape: f32[16,32], index: 0, kind: input, shape index: {}]   ;;  %s5032_s1 = inlined_call_operand.hbm [shape: bf16[32,32], index: 1, kind: input, shape index: {}]   ;;  %s5033_s2 = inlined_call_operand.hbm [shape: f32[1,32], index: 2, kind: input, shape index: {}]   ;;  %s5034_s3 = inlined_call_operand.hbm [shape: bf16[32,32], index: 3, kind: input, shape index: {}]   ;;  %s5035_s4 = inlined_call_operand.hbm [shape: f32[1,32], index: 4, kind: input, shape index: {}]   ;;  %s5036_s5 = inlined_call_operand.hbm [shape: bf16[32,32], index: 5, kind: input, shape index: {}]   ;;  %s5037_s6 = inlined_call_operand.hbm [shape: f32[1,32], index: 6, kind: input, shape index: {}]   ;;  %s5038_s7 = inlined_call_operand.hbm [shape: bf16[32,32], index: 7, kind: input, shape index: {}]   ;;  %s5039_s8 = inlined_call_operand.hbm [shape: f32[1,32], index: 8, kind: input, shape index: {}]   ;;  %s5040_s9 = inlined_call_operand.vmem [shape: bf16[32,256], index: 9, kind: input, shape index: {}]   ;;  %s5041_s10 = inlined_call_operand.vmem [shape: f32[1,256], index: 10, kind: input, shape index: {}]   ;;  %s5042_s11 = inlined_call_operand.hbm [shape: f32[72,128], index: 11, kind: input, shape index: {}]   ;;  %s5043_s12 = inlined_call_operand.hbm [shape: f32[72,128], index: 12, kind: input, shape index: {}]   ;;  %s5044_s13 = inlined_call_operand.hbm [shape: f32[144,128], index: 13, kind: input, shape index: {}]   ;;  %s5045_s14 = inlined_call_operand.hbm [shape: f32[16,128], index: 14, kind: output, shape index: {}]  }
   0x1   :  { %5064 = sst [smem:[#allocation37_spill]] %s5031_s0 }
   0x2   :  { %5065 = sst [smem:[#allocation38_spill]] %s5032_s1 }
   0x3   :  { %5066 = sst [smem:[#allocation39_spill]] %s5034_s3 }
   0x4   :  { %5067 = sst [smem:[#allocation40_spill]] %s5040_s9 }
   0x5   :  { %5068 = sst [smem:[#allocation41_spill]] %s5041_s10 }
   0x6   :  { %5069 = sst [smem:[#allocation42_spill]] %s5045_s14 }
   0x7   :  { %19 = vsyncpa [#allocation5], 0 }
   0x8   :  { %21 = vsyncpa [#allocation5 + $0x1], 0 }
   0x9   :  { %22 = vsyncpa [#allocation8], 0 }
   0xa   :  { %23 = vsyncpa [#allocation11], 0 }
   0xb   :  { %24 = vsyncpa [#allocation14], 0 }
   0xc   :  { %25 = vsyncpa [#allocation17], 0 }
   0xd   :  { %26 = vsyncpa [#allocation20], 0 }
   0xe   :  { %27 = vsyncpa [#allocation23], 0 }
   0xf   :  { %28 = vsyncpa [#allocation6], 0 }
  0x10   :  { %30 = vsyncpa [#allocation6 + $0x1], 0  ;;  %s3948_s29 = smov 0   ;;  %s3950_s30 = smov 0  }
  0x11   :  { %s3952_s15 = smov 0   ;;  %s3954_s16 = smov 0  }
  0x12 LB: > { %s3835_s17 = smov [#allocation7]   ;;  %s3969_s19 = sadd.s32 4294967295, %s3829_s16   ;;  %s3829_s16 = sphi %s3954_s16, %s5120_s16   ;;  %s3825_s15 = sphi %s3952_s15, %s5119_s15   ;;  %s3821_s30 = sphi %s3950_s30, %s5118_s30   ;;  %s3817_s29 = sphi %s3948_s29, %s5117_s29  }
  0x13   : > { %s378_s18 = sshll.u32 %s3835_s17, 4  ;;  %5070 = sst [smem:[#allocation33_spill]] %s3969_s19  ;;  %s3974_s18 = int_to_ptr.vmem [resolvable:$true] %s378_s18 }
  0x14   : > { %p2879_p0 = scmp.ge.s32.totalorder %s3829_s16, 1  ;;  %p5053_p1 = scmp.eq.s32.totalorder %s3969_s19, 0 }
  0x15   : > { %p366_p2 = scmp.lt.s32.totalorder %s3829_s16, 3  ;;  %s3836_s21 = smov [#allocation10]  }
  0x16   : > { %s402_s22 = sshll.u32 %s3836_s21, 4  ;;  %s3837_s24 = smov [#allocation13]   ;;  %s3989_s22 = int_to_ptr.vmem [resolvable:$true] %s402_s22 }
  0x17   : > { %p3976_p3 = pnand %p2879_p0, %p366_p2  ;;  %s426_s25 = sshll.u32 %s3837_s24, 4  ;;  %s3991_s25 = int_to_ptr.vmem [resolvable:$true] %s426_s25 }
  0x18   : > { %s5074_s1 = sld [smem:[#allocation38_spill]] }
  0x19   : > { %s5071_s20 = scalar_select %p3976_p3, 1, 0 }
  0x1a   : > { %p3210_p5 = pneg %p3976_p3 }
  0x1b   : > { %5072 = sst [smem:[#allocation34_spill]] %s5071_s20 }
  0x1c   : > { %p3985_p6 = pnand %p3210_p5, %p5053_p1 }
  0x1e   : > { %s3397_s28 = scalar_lea.hbm %s5074_s1, 256  ;;  %p4001_p8 = pneg %p3985_p6 }
  0x1f   : > { %p3398_p7 = scmp.ne.s32.totalorder %s5074_s1, %s3397_s28  ;;  %p3404_p11 = scmp.lt.u32.totalorder %s3397_s28, %s5074_s1 }
  0x21   : > { %p3400_p9 = pnand %p4001_p8, %p3398_p7 }
  0x23   : > { %p3401_p10 = pneg %p3400_p9 }
  0x25   : > { %p3406_p12 = pnand %p3404_p11, %p3401_p10 }
  0x27   : > { %3409 = shalt.err (!%p3406_p12)
}
  0x28   : > { %s3410_s14 = scalar_lea.vmem %s3974_s18, 256  ;;  %p3418_p5 = scmp.lt.s32.totalorder %s3974_s18, %s3974_s18 }
  0x29   : > { %p3411_p13 = scmp.ne.s32.totalorder %s3974_s18, %s3410_s14  ;;  %p3419_p4 = scmp.lt.s32.totalorder %s3410_s14, %s3410_s14 }
  0x2b   : > { %p3413_p0 = pnand %p3411_p13, %p4001_p8  ;;  %p3420_p7 = por %p3419_p4, %p3418_p5 }
  0x2d   : > { %p3414_p2 = pneg %p3413_p0 }
  0x2f   : > { %p3421_p9 = pnand %p3420_p7, %p3414_p2 }
  0x31   : > { %3424 = shalt.err (!%p3421_p9)
}
  0x32   : > { %s3838_s26 = smov 64   ;;  %s3839_s10 = smov 4  }
  0x33   : > { %3213 = dma.hbm_to_vmem [thread:$0]  (!%p3985_p6), %s5074_s1, 256, %s3974_s18, [#allocation8], %s3838_s26, %s3838_s26, %s3839_s10  }
  0x34   : > { %s5076_s3 = sld [smem:[#allocation39_spill]] }
  0x3a   : > { %s3425_s14 = scalar_lea.hbm %s5076_s3, 256 }
  0x3b   : > { %p3426_p4 = scmp.ne.s32.totalorder %s5076_s3, %s3425_s14  ;;  %p3432_p12 = scmp.lt.u32.totalorder %s3425_s14, %s5076_s3 }
  0x3d   : > { %p3428_p10 = pnand %p3426_p4, %p4001_p8 }
  0x3f   : > { %p3429_p11 = pneg %p3428_p10 }
  0x41   : > { %p3434_p13 = pnand %p3432_p12, %p3429_p11 }
  0x43   : > { %3437 = shalt.err (!%p3434_p13)
}
  0x44   : > { %s3438_s18 = scalar_lea.vmem %s3989_s22, 256  ;;  %p3446_p7 = scmp.lt.s32.totalorder %s3989_s22, %s3989_s22 }
  0x45   : > { %p3439_p0 = scmp.ne.s32.totalorder %s3989_s22, %s3438_s18  ;;  %p3447_p9 = scmp.lt.s32.totalorder %s3438_s18, %s3438_s18 }
  0x47   : > { %p3441_p2 = pnand %p3439_p0, %p4001_p8  ;;  %p3448_p4 = por %p3447_p9, %p3446_p7 }
  0x49   : > { %p3442_p5 = pneg %p3441_p2 }
  0x4b   : > { %p3449_p10 = pnand %p3448_p4, %p3442_p5 }
  0x4d   : > { %3452 = shalt.err (!%p3449_p10)
}
  0x4e   : > { %3219 = dma.hbm_to_vmem [thread:$0]  (!%p3985_p6), %s5076_s3, 256, %s3989_s22, [#allocation11], %s3838_s26, %s3838_s26, %s3839_s10  }
  0x4f   : > { %s3453_s27 = scalar_lea.hbm %s5036_s5, 256 }
  0x50   : > { %p3454_p11 = scmp.ne.s32.totalorder %s5036_s5, %s3453_s27  ;;  %p3460_p0 = scmp.lt.u32.totalorder %s3453_s27, %s5036_s5 }
  0x52   : > { %p3456_p12 = pnand %p3454_p11, %p4001_p8 }
  0x54   : > { %p3457_p13 = pneg %p3456_p12 }
  0x56   : > { %p3462_p2 = pnand %p3460_p0, %p3457_p13 }
  0x58   : > { %3465 = shalt.err (!%p3462_p2)
}
  0x59   : > { %s3466_s22 = scalar_lea.vmem %s3991_s25, 256  ;;  %p3474_p4 = scmp.lt.s32.totalorder %s3991_s25, %s3991_s25 }
  0x5a   : > { %p3467_p5 = scmp.ne.s32.totalorder %s3991_s25, %s3466_s22  ;;  %p3475_p10 = scmp.lt.s32.totalorder %s3466_s22, %s3466_s22 }
  0x5c   : > { %p3469_p7 = pnand %p3467_p5, %p4001_p8  ;;  %p3476_p11 = por %p3475_p10, %p3474_p4 }
  0x5e   : > { %p3470_p9 = pneg %p3469_p7 }
  0x60   : > { %p3477_p12 = pnand %p3476_p11, %p3470_p9 }
  0x62   : > { %3480 = shalt.err (!%p3477_p12)
}
  0x63   : > { %3225 = dma.hbm_to_vmem [thread:$0]  (!%p3985_p6), %s5036_s5, 256, %s3991_s25, [#allocation14], %s3838_s26, %s3838_s26, %s3839_s10  }
  0x64   : > { %s3840_s9 = smov [#allocation16]   ;;  %s3841_s20 = smov [#allocation19]  }
  0x65   : > { %s450_s19 = sshll.u32 %s3840_s9, 4  ;;  %s480_s27 = sshll.u32 %s3841_s20, 4  ;;  %s451_s19 = int_to_ptr.vmem [resolvable:$true] %s450_s19  ;;  %s481_s27 = int_to_ptr.vmem [resolvable:$true] %s480_s27 }
  0x66   : > { %s3481_s24 = scalar_lea.hbm %s5038_s7, 256 }
  0x67   : > { %p3482_p13 = scmp.ne.s32.totalorder %s5038_s7, %s3481_s24  ;;  %p3488_p5 = scmp.lt.u32.totalorder %s3481_s24, %s5038_s7 }
  0x69   : > { %p3484_p0 = pnand %p3482_p13, %p4001_p8 }
  0x6b   : > { %p3485_p2 = pneg %p3484_p0 }
  0x6d   : > { %p3490_p7 = pnand %p3488_p5, %p3485_p2 }
  0x6f   : > { %3493 = shalt.err (!%p3490_p7)
}
  0x70   : > { %s3494_s25 = scalar_lea.vmem %s451_s19, 256  ;;  %p3502_p11 = scmp.lt.s32.totalorder %s451_s19, %s451_s19 }
  0x71   : > { %p3495_p9 = scmp.ne.s32.totalorder %s451_s19, %s3494_s25  ;;  %p3503_p12 = scmp.lt.s32.totalorder %s3494_s25, %s3494_s25 }
  0x73   : > { %p3497_p4 = pnand %p3495_p9, %p4001_p8  ;;  %p3504_p1 = por %p3503_p12, %p3502_p11 }
  0x75   : > { %p3498_p10 = pneg %p3497_p4 }
  0x77   : > { %p3505_p3 = pnand %p3504_p1, %p3498_p10 }
  0x79   : > { %3508 = shalt.err (!%p3505_p3)
}
  0x7a   : > { %3231 = dma.hbm_to_vmem [thread:$0]  (!%p3985_p6), %s5038_s7, 256, %s451_s19, [#allocation17], %s3838_s26, %s3838_s26, %s3839_s10  }
  0x7b   : > { %s3509_s28 = scalar_lea.hbm %s5042_s11, 1152 }
  0x7c   : > { %p3510_p1 = scmp.ne.s32.totalorder %s5042_s11, %s3509_s28  ;;  %p3516_p0 = scmp.lt.u32.totalorder %s3509_s28, %s5042_s11 }
  0x7e   : > { %p3512_p3 = pnand %p3510_p1, %p4001_p8 }
  0x80   : > { %p3513_p13 = pneg %p3512_p3 }
  0x82   : > { %p3518_p2 = pnand %p3516_p0, %p3513_p13 }
  0x84   : > { %3521 = shalt.err (!%p3518_p2)
}
  0x85   : > { %s3522_s18 = scalar_lea.vmem %s481_s27, 1152  ;;  %p3530_p4 = scmp.lt.s32.totalorder %s481_s27, %s481_s27 }
  0x86   : > { %p3523_p5 = scmp.ne.s32.totalorder %s481_s27, %s3522_s18  ;;  %p3531_p10 = scmp.lt.s32.totalorder %s3522_s18, %s3522_s18 }
  0x88   : > { %p3525_p7 = pnand %p3523_p5, %p4001_p8  ;;  %p3532_p11 = por %p3531_p10, %p3530_p4 }
  0x8a   : > { %p3526_p9 = pneg %p3525_p7 }
  0x8c   : > { %p3533_p12 = pnand %p3532_p11, %p3526_p9 }
  0x8e   : > { %3536 = shalt.err (!%p3533_p12)
}
  0x8f   : > { %s3842_s26 = smov 128   ;;  %s3843_s10 = smov 8  }
  0x90   : > { %3237 = dma.hbm_to_vmem [thread:$0]  (!%p3985_p6), %s5042_s11, 1152, %s481_s27, [#allocation20], %s3842_s26, %s3842_s26, %s3843_s10  }
  0x91   : > { %s3844_s1 = smov [#allocation9]   ;;  %s3845_s9 = smov [#allocation12]  }
  0x92   : > { %s392_s0 = sshll.u32 %s3844_s1, 4  ;;  %s416_s20 = sshll.u32 %s3845_s9, 4  ;;  %s393_s0 = int_to_ptr.vmem [resolvable:$true] %s392_s0  ;;  %s417_s20 = int_to_ptr.vmem [resolvable:$true] %s416_s20 }
  0x93   : > { %s3537_s24 = scalar_lea.hbm %s5033_s2, 16 }
  0x94   : > { %p3538_p1 = scmp.ne.s32.totalorder %s5033_s2, %s3537_s24  ;;  %p3544_p0 = scmp.lt.u32.totalorder %s3537_s24, %s5033_s2 }
  0x96   : > { %p3540_p3 = pnand %p3538_p1, %p4001_p8 }
  0x98   : > { %p3541_p13 = pneg %p3540_p3 }
  0x9a   : > { %p3546_p2 = pnand %p3544_p0, %p3541_p13 }
  0x9c   : > { %3549 = shalt.err (!%p3546_p2)
}
  0x9d   : > { %s3550_s27 = scalar_lea.vmem %s393_s0, 16  ;;  %s3557_s19 = scalar_lea.vmem %s393_s0, 32 }
  0x9e   : > { %p3551_p5 = scmp.ne.s32.totalorder %s393_s0, %s3550_s27  ;;  %p3558_p4 = scmp.lt.s32.totalorder %s393_s0, %s393_s0 }
  0x9f   : > { %p3559_p10 = scmp.lt.s32.totalorder %s3557_s19, %s3550_s27 }
  0xa0   : > { %p3553_p7 = pnand %p3551_p5, %p4001_p8 }
  0xa1   : > { %p3560_p11 = por %p3559_p10, %p3558_p4 }
  0xa2   : > { %p3554_p9 = pneg %p3553_p7 }
  0xa4   : > { %p3561_p12 = pnand %p3560_p11, %p3554_p9 }
  0xa6   : > { %3564 = shalt.err (!%p3561_p12)
}
  0xa7   : > { %3216 = dma.hbm_to_vmem [thread:$0]  (!%p3985_p6), %s5033_s2, 16, %s393_s0, [#allocation8]  }
  0xa8   : > { %s3565_s28 = scalar_lea.hbm %s5035_s4, 16 }
  0xa9   : > { %p3566_p1 = scmp.ne.s32.totalorder %s5035_s4, %s3565_s28  ;;  %p3572_p0 = scmp.lt.u32.totalorder %s3565_s28, %s5035_s4 }
  0xab   : > { %p3568_p3 = pnand %p3566_p1, %p4001_p8 }
  0xad   : > { %p3569_p13 = pneg %p3568_p3 }
  0xaf   : > { %p3574_p2 = pnand %p3572_p0, %p3569_p13 }
  0xb1   : > { %3577 = shalt.err (!%p3574_p2)
}
  0xb2   : > { %s3578_s18 = scalar_lea.vmem %s417_s20, 16  ;;  %s3585_s0 = scalar_lea.vmem %s417_s20, 32 }
  0xb3   : > { %p3579_p5 = scmp.ne.s32.totalorder %s417_s20, %s3578_s18  ;;  %p3586_p4 = scmp.lt.s32.totalorder %s417_s20, %s417_s20 }
  0xb4   : > { %p3587_p10 = scmp.lt.s32.totalorder %s3585_s0, %s3578_s18 }
  0xb5   : > { %p3581_p7 = pnand %p3579_p5, %p4001_p8 }
  0xb6   : > { %p3588_p11 = por %p3587_p10, %p3586_p4 }
  0xb7   : > { %p3582_p9 = pneg %p3581_p7 }
  0xb9   : > { %p3589_p12 = pnand %p3588_p11, %p3582_p9 }
  0xbb   : > { %3592 = shalt.err (!%p3589_p12)
}
  0xbc   : > { %3222 = dma.hbm_to_vmem [thread:$0]  (!%p3985_p6), %s5035_s4, 16, %s417_s20, [#allocation11]  }
  0xbd   : > { %s3846_s25 = smov [#allocation15]   ;;  %s3847_s3 = smov [#allocation18]  }
  0xbe   : > { %s440_s1 = sshll.u32 %s3846_s25, 4  ;;  %s464_s9 = sshll.u32 %s3847_s3, 4  ;;  %s441_s1 = int_to_ptr.vmem [resolvable:$true] %s440_s1  ;;  %s465_s9 = int_to_ptr.vmem [resolvable:$true] %s464_s9 }
  0xbf   : > { %s3593_s24 = scalar_lea.hbm %s5037_s6, 16 }
  0xc0   : > { %p3594_p1 = scmp.ne.s32.totalorder %s5037_s6, %s3593_s24  ;;  %p3600_p0 = scmp.lt.u32.totalorder %s3593_s24, %s5037_s6 }
  0xc2   : > { %p3596_p3 = pnand %p3594_p1, %p4001_p8 }
  0xc4   : > { %p3597_p13 = pneg %p3596_p3 }
  0xc6   : > { %p3602_p2 = pnand %p3600_p0, %p3597_p13 }
  0xc8   : > { %3605 = shalt.err (!%p3602_p2)
}
  0xc9   : > { %s3606_s20 = scalar_lea.vmem %s441_s1, 16  ;;  %s3613_s27 = scalar_lea.vmem %s441_s1, 32 }
  0xca   : > { %p3607_p5 = scmp.ne.s32.totalorder %s441_s1, %s3606_s20  ;;  %p3614_p4 = scmp.lt.s32.totalorder %s441_s1, %s441_s1 }
  0xcb   : > { %p3615_p10 = scmp.lt.s32.totalorder %s3613_s27, %s3606_s20 }
  0xcc   : > { %p3609_p7 = pnand %p3607_p5, %p4001_p8 }
  0xcd   : > { %p3616_p11 = por %p3615_p10, %p3614_p4 }
  0xce   : > { %p3610_p9 = pneg %p3609_p7 }
  0xd0   : > { %p3617_p12 = pnand %p3616_p11, %p3610_p9 }
  0xd2   : > { %3620 = shalt.err (!%p3617_p12)
}
  0xd3   : > { %3228 = dma.hbm_to_vmem [thread:$0]  (!%p3985_p6), %s5037_s6, 16, %s441_s1, [#allocation14]  }
  0xd4   : > { %s3621_s17 = scalar_lea.hbm %s5039_s8, 16 }
  0xd5   : > { %p3622_p1 = scmp.ne.s32.totalorder %s5039_s8, %s3621_s17  ;;  %p3628_p0 = scmp.lt.u32.totalorder %s3621_s17, %s5039_s8 }
  0xd7   : > { %p3624_p3 = pnand %p3622_p1, %p4001_p8 }
  0xd9   : > { %p3625_p13 = pneg %p3624_p3 }
  0xdb   : > { %p3630_p2 = pnand %p3628_p0, %p3625_p13 }
  0xdd   : > { %3633 = shalt.err (!%p3630_p2)
}
  0xde   : > { %s3634_s0 = scalar_lea.vmem %s465_s9, 16  ;;  %s3641_s1 = scalar_lea.vmem %s465_s9, 32 }
  0xdf   : > { %p3635_p5 = scmp.ne.s32.totalorder %s465_s9, %s3634_s0  ;;  %p3642_p4 = scmp.lt.s32.totalorder %s465_s9, %s465_s9 }
  0xe0   : > { %p3643_p10 = scmp.lt.s32.totalorder %s3641_s1, %s3634_s0 }
  0xe1   : > { %p3637_p7 = pnand %p3635_p5, %p4001_p8 }
  0xe2   : > { %p3644_p11 = por %p3643_p10, %p3642_p4 }
  0xe3   : > { %p3638_p9 = pneg %p3637_p7 }
  0xe5   : > { %p3645_p12 = pnand %p3644_p11, %p3638_p9 }
  0xe7   : > { %3648 = shalt.err (!%p3645_p12)
}
  0xe8   : > { %3234 = dma.hbm_to_vmem [thread:$0]  (!%p3985_p6), %s5039_s8, 16, %s465_s9, [#allocation17]  }
  0xe9   : > { %s3848_s19 = smov [#allocation21]   ;;  %s3849_s3 = smov [#allocation22]  }
  0xea   : > { %s493_s25 = sshll.u32 %s3848_s19, 4  ;;  %s506_s28 = sshll.u32 %s3849_s3, 4  ;;  %s494_s25 = int_to_ptr.vmem [resolvable:$true] %s493_s25  ;;  %s507_s28 = int_to_ptr.vmem [resolvable:$true] %s506_s28 }
  0xeb   : > { %s3649_s14 = scalar_lea.hbm %s5043_s12, 1152 }
  0xec   : > { %p3650_p1 = scmp.ne.s32.totalorder %s5043_s12, %s3649_s14  ;;  %p3656_p0 = scmp.lt.u32.totalorder %s3649_s14, %s5043_s12 }
  0xee   : > { %p3652_p3 = pnand %p3650_p1, %p4001_p8 }
  0xf0   : > { %p3653_p13 = pneg %p3652_p3 }
  0xf2   : > { %p3658_p2 = pnand %p3656_p0, %p3653_p13 }
  0xf4   : > { %3661 = shalt.err (!%p3658_p2)
}
  0xf5   : > { %s3662_s9 = scalar_lea.vmem %s494_s25, 1152  ;;  %p3670_p4 = scmp.lt.s32.totalorder %s494_s25, %s494_s25 }
  0xf6   : > { %p3663_p5 = scmp.ne.s32.totalorder %s494_s25, %s3662_s9  ;;  %p3671_p10 = scmp.lt.s32.totalorder %s3662_s9, %s3662_s9 }
  0xf8   : > { %p3665_p7 = pnand %p3663_p5, %p4001_p8  ;;  %p3672_p11 = por %p3671_p10, %p3670_p4 }
  0xfa   : > { %p3666_p9 = pneg %p3665_p7 }
  0xfc   : > { %p3673_p12 = pnand %p3672_p11, %p3666_p9 }
  0xfe   : > { %3676 = shalt.err (!%p3673_p12)
}
  0xff   : > { %3240 = dma.hbm_to_vmem [thread:$0]  (!%p3985_p6), %s5043_s12, 1152, %s494_s25, [#allocation20], %s3842_s26, %s3842_s26, %s3843_s10  }
 0x100   : > { %s3677_s17 = scalar_lea.hbm %s5044_s13, 2304 }
 0x101   : > { %p3678_p1 = scmp.ne.s32.totalorder %s5044_s13, %s3677_s17  ;;  %p3684_p0 = scmp.lt.u32.totalorder %s3677_s17, %s5044_s13 }
 0x103   : > { %p3680_p3 = pnand %p3678_p1, %p4001_p8 }
 0x105   : > { %p3681_p13 = pneg %p3680_p3 }
 0x107   : > { %p3686_p2 = pnand %p3684_p0, %p3681_p13 }
 0x109   : > { %3689 = shalt.err (!%p3686_p2)
}
 0x10a   : > { %s3690_s0 = scalar_lea.vmem %s507_s28, 2304  ;;  %p3698_p4 = scmp.lt.s32.totalorder %s507_s28, %s507_s28 }
 0x10b   : > { %p3691_p5 = scmp.ne.s32.totalorder %s507_s28, %s3690_s0  ;;  %p3699_p10 = scmp.lt.s32.totalorder %s3690_s0, %s3690_s0 }
 0x10d   : > { %p3693_p7 = pnand %p3691_p5, %p4001_p8  ;;  %p3700_p11 = por %p3699_p10, %p3698_p4 }
 0x10f   : > { %p3694_p9 = pneg %p3693_p7 }
 0x111   : > { %p3701_p12 = pnand %p3700_p11, %p3694_p9 }
 0x113   : > { %3704 = shalt.err (!%p3701_p12)
}
 0x114   : > { %s5077_s21 = sld [smem:[#allocation33_spill]]  ;;  %s2878_s23 = sadd.s32 4294967294, %s3829_s16  }
 0x115   : > { %3243 = dma.hbm_to_vmem [thread:$0]  (!%p3985_p6), %s5044_s13, 2304, %s507_s28, [#allocation23], %s3842_s26, %s3842_s26, %s3843_s10  }
 0x116   : > { %s4235_s9 = sadd.s32 1, %s3829_s16   ;;  %s43_s20 = sadd.s32 1, %s3825_s15 }
 0x117   : > { %s40_s27 = ssub.s32 %s3829_s16, %s4235_s9  ;;  %p50_p8 = scmp.ne.s32.totalorder %s3825_s15, %s3821_s30 }
 0x118   : > { %p41_p1 = scmp.eq.s32.totalorder %s40_s27, 0  ;;  %p51_p3 = scmp.eq.s32.totalorder %s3829_s16, 0 }
 0x119   : > { %p56_p13 = scmp.ne.s32.totalorder %s3821_s30, %s3817_s29  ;;  %p359_p9 = scmp.eq.s32.totalorder %s2878_s23, 1 }
 0x11a   : > { %p353_p0 = scmp.eq.s32.totalorder %s5077_s21, 1  ;;  %p52_p2 = por %p51_p3, %p50_p8 }
 0x11b   : > { %s4247_s19 = scalar_select %p41_p1, %s3825_s15, %s43_s20  }
 0x11c   : > { %p5078_p5 = scmp.eq.s32.totalorder %s5077_s21, 0  ;;  %p4255_p6 = por %p353_p0, %p50_p8 }
 0x11d   : > { %p3263_p4 = scmp.lt.s32.totalorder %s3829_s16, 2  ;;  %s520_s10 = sand.u32 1, %s3825_s15  }
 0x11e   : > { %p4251_p7 = por %p5078_p5, %p56_p13  ;;  %p4261_p10 = por %p359_p9, %p56_p13 }
 0x11f   : > { %s5080_s26 = scalar_select %p4255_p6, 1, 0 }
 0x120   : > { %s5081_s28 = scalar_select %p4261_p10, 1, 0 }
 0x121   : > { %s2892_s17 = sshll.u32 %s520_s10, 3  ;;  %s2893_s24 = sshll.u32 %s3829_s16, 7 }
 0x122   : > { %s5082_s18 = sld [smem:[#allocation37_spill]]  ;;  %s524_s25 = scalar_lea.vmem [#allocation4], %s2892_s17 }
 0x123   : > { %s531_s1 = sshll.u32 %s524_s25, 4  ;;  %p4271_p11 = pnand %p3263_p4, %p52_p2  ;;  %s4275_s1 = int_to_ptr.vmem [resolvable:$true] %s531_s1 }
 0x124   : > { %s521_s23 = scalar_lea.sflag [#allocation5], %s520_s10 }
 0x125   : > { %p3707_p8 = pneg %p4271_p11 }
 0x128   : > { %s4269_s0 = scalar_lea.hbm %s5082_s18, %s2893_s24  ;;  %s3710_s24 = scalar_lea.hbm %s5082_s18, 256 }
 0x129   : > { %s3705_s20 = scalar_lea.hbm %s4269_s0, 128  ;;  %p3711_p13 = scmp.lt.u32.totalorder %s4269_s0, %s5082_s18 }
 0x12a   : > { %p3706_p12 = scmp.ne.s32.totalorder %s4269_s0, %s3705_s20  ;;  %p3712_p0 = scmp.lt.u32.totalorder %s3710_s24, %s3705_s20 }
 0x12b   : > { %p3714_p5 = scmp.lt.u32.totalorder %s3705_s20, %s4269_s0 }
 0x12c   : > { %p3708_p1 = pnand %p3707_p8, %p3706_p12  ;;  %p3713_p2 = por %p3712_p0, %p3711_p13 }
 0x12e   : > { %p3709_p3 = pneg %p3708_p1  ;;  %p3715_p9 = por %p3714_p5, %p3713_p2 }
 0x130   : > { %p3716_p4 = pnand %p3715_p9, %p3709_p3 }
 0x132   : > { %3719 = shalt.err (!%p3716_p4)
}
 0x133   : > { %s3720_s10 = scalar_lea.vmem %s4275_s1, 128  ;;  %s3850_s25 = smov [#allocation4]  }
 0x134   : > { %p3721_p12 = scmp.ne.s32.totalorder %s4275_s1, %s3720_s10  ;;  %s3725_s27 = sshll.u32 %s3850_s25, 4  ;;  %s3726_s27 = int_to_ptr.vmem [resolvable:$false] %s3725_s27 }
 0x135   : > { %s3727_s17 = scalar_lea.vmem %s3726_s27, 256  ;;  %p3728_p6 = scmp.lt.s32.totalorder %s4275_s1, %s3726_s27 }
 0x136   : > { %p3723_p1 = pnand %p3721_p12, %p3707_p8  ;;  %p3729_p13 = scmp.lt.s32.totalorder %s3727_s17, %s3720_s10 }
 0x138   : > { %p3724_p10 = pneg %p3723_p1  ;;  %p3730_p0 = por %p3729_p13, %p3728_p6 }
 0x13a   : > { %p3731_p2 = pnand %p3730_p0, %p3724_p10 }
 0x13c   : > { %3734 = shalt.err (!%p3731_p2)
}
 0x13d   : > { %3247 = dma.hbm_to_vmem [thread:$0]  (!%p4271_p11), %s4269_s0, 128, %s4275_s1, %s521_s23  }
 0x13e   : > { %s5084_s20 = sld [smem:[#allocation34_spill]] }
 0x144   : > { %p5085_p3 = scmp.ne.s32.totalorder %s5084_s20, 0 }
 0x146   : > { %540 = sbr.rel (%p5085_p3) target bundleno = 2549 (0x9f5), region = 76 }
 0x14d   : > { %s4305_s24 = sand.u32 1, %s3821_s30  }
 0x14e   : > { %s2895_s14 = sshll.u32 %s4305_s24, 3  ;;  %s543_s22 = scalar_lea.sflag [#allocation5], %s4305_s24 }
 0x14f   : > { %s4311_s10 = scalar_lea.vmem [#allocation4], %s2895_s14 }
 0x150   : > { %3784 = dma.done.wait (%p4251_p7), %s543_s22, 128  }
 0x151   : > { %3786 = vsyncadd (%p4251_p7), %s543_s22, 4294967168  ;;  %s5086_s0 = sld [smem:[#allocation33_spill]] }
 0x157   : > { %p5087_p6 = scmp.eq.s32.totalorder %s5086_s0, 0 }
 0x159   : > { %3788 = dma.done.wait (%p5087_p6), [#allocation8], 272   ;;  %p5088_p10 = pmov %p5087_p6 }
 0x15a   : > { %p5089_p11 = pmov %p5087_p6 }
 0x15b   : > { %3790 = vsyncadd (%p5088_p10), [#allocation8], 4294967024 }
 0x15c   : > { %3792 = dma.done.wait (%p5089_p11), [#allocation11], 272   ;;  %p5090_p8 = pmov %p5087_p6 }
 0x15d   : > { %p5091_p5 = pmov %p5087_p6 }
 0x15e   : > { %3794 = vsyncadd (%p5090_p8), [#allocation11], 4294967024 }
 0x15f   : > { %3796 = dma.done.wait (%p5091_p5), [#allocation14], 272   ;;  %p5092_p9 = pmov %p5091_p5 }
 0x160   : > { %p5093_p7 = pmov %p5091_p5 }
 0x161   : > { %3798 = vsyncadd (%p5092_p9), [#allocation14], 4294967024 }
 0x162   : > { %3800 = dma.done.wait (%p5093_p7), [#allocation17], 272   ;;  %p5094_p4 = pmov %p5091_p5 }
 0x164   : > { %3802 = vsyncadd (%p5094_p4), [#allocation17], 4294967024  ;;  %p5095_p12 = pmov %p5094_p4 }
 0x165   : > { %p5096_p1 = pmov %p5094_p4 }
 0x166   : > { %3804 = dma.done.wait (%p5095_p12), [#allocation20], 2304  }
 0x167   : > { %3806 = vsyncadd (%p5096_p1), [#allocation20], 4294964992  ;;  %p5097_p13 = pmov %p5096_p1 }
 0x168   : > { %p5098_p0 = pmov %p5096_p1 }
 0x169   : > { %3808 = dma.done.wait (%p5097_p13), [#allocation23], 2304  }
 0x16a   : > { %3810 = vsyncadd (%p5098_p0), [#allocation23], 4294964992  ;;  %v3851_v0 = vmov 0.0   ;;  %vm3852_vm0 = vmmov 0   ;;  %v4347_v1 = vld [vmem:[#allocation19] sm:$0xff]  ;;  %v4349_v2 = vld [vmem:[#allocation19 + $0x8] sm:$0xff] }
 0x16b   : > { %3009 = vmatprep.subr.bf16.mxu0 %v3851_v0  ;;  %3013 = vmatprep.mubr.msk.bf16.mxu0 %vm3852_vm0, %v3851_v0  ;;  %v4351_v3 = vld [vmem:[#allocation19 + $0x10] sm:$0xff]  ;;  %v4353_v4 = vld [vmem:[#allocation19 + $0x18] sm:$0xff]  ;;  %v4355_v5 = vld [vmem:[#allocation19 + $0x20] sm:$0xff]  ;;  %vm661_vm1 = vcmask 261120   ;;  %v3853_v41 = vmov 683565275  }
 0x16c   : > { %3017 = vmatprep.subr.bf16.mxu1 %v3851_v0  ;;  %3021 = vmatprep.mubr.msk.bf16.mxu1 %vm3852_vm0, %v3851_v0  ;;  %v4357_v6 = vld [vmem:[#allocation19 + $0x28] sm:$0xff]  ;;  %v4359_v7 = vld [vmem:[#allocation19 + $0x30] sm:$0xff]  ;;  %v4361_v8 = vld [vmem:[#allocation19 + $0x38] sm:$0xff]  ;;  %v3854_v43 = vmov 2475754826   ;;  %s5099_s21 = sld [smem:[#allocation40_spill]] }
 0x16d   : > { %v4363_v9 = vld [vmem:[#allocation19 + $0x40] sm:$0xff]  ;;  %v4365_v10 = vld [vmem:[#allocation21] sm:$0xff]  ;;  %v4367_v11 = vld [vmem:[#allocation21 + $0x8] sm:$0xff]  ;;  %v3855_v46 = vmov 2131351028   ;;  %s5102_s3 = sld [smem:[#allocation41_spill]] }
 0x16e   : > { %v4369_v12 = vld [vmem:[#allocation21 + $0x10] sm:$0xff]  ;;  %v4371_v13 = vld [vmem:[#allocation21 + $0x18] sm:$0xff]  ;;  %v4373_v14 = vld [vmem:[#allocation21 + $0x20] sm:$0xff]  ;;  %v3856_v49 = vmov 2102212464   ;;  %s4562_s1 = scalar_lea.vmem [#allocation24], %s2895_s14 }
 0x16f   : > { %v4375_v15 = vld [vmem:[#allocation21 + $0x28] sm:$0xff]  ;;  %v4377_v16 = vld [vmem:[#allocation21 + $0x30] sm:$0xff]  ;;  %v4379_v17 = vld [vmem:[#allocation21 + $0x38] sm:$0xff]  ;;  %v3857_v52 = vmov 920167782   ;;  %s4564_s23 = smov 0  }
 0x170   : > { %v4381_v18 = vld [vmem:[#allocation21 + $0x40] sm:$0xff]  ;;  %v3352_v19 = vld [vmem:[#allocation7] sm:$0xff]   ;;  %v3353_v20 = vld [vmem:[#allocation7 + $0x8] sm:$0xff]   ;;  %v3858_v55 = vmov 1326507024  }
 0x171   : > { %3010 = vmatpush3.bf16.msra.mxu0 %v3352_v19  ;;  %v636_v21 = vld [vmem:[%s4311_s10] sm:$0xff] }
 0x172   : > { %3011 = vmatprep.subr.bf16.mxu0 %v3851_v0  ;;  %v637_v22 = vpack.c.bf16 %v636_v21, %v636_v21  ;;  %v3354_v23 = vld [vmem:[#allocation10] sm:$0xff]   ;;  %v3355_v24 = vld [vmem:[#allocation10 + $0x8] sm:$0xff]   ;;  %v2908_v25 = vld [vmem:[#allocation9] ss:$0 sm:$0xff] }
 0x173   : > { %3018 = vmatpush3.bf16.msra.mxu1 %v3354_v23 }
 0x174   : > { %3019 = vmatprep.subr.bf16.mxu1 %v3851_v0 }
 0x175   : > { %3012 = vmatpush3.bf16.msra.mxu0 %v3353_v20 }
 0x176   : > { %3025 = vmatprep.subr.bf16.mxu0 %v3851_v0 }
 0x177   : > { %3020 = vmatpush3.bf16.msra.mxu1 %v3355_v24 }
 0x178   : > { %3014 = vmatmul.mubr.msk.bf16.vlgmr.msra.gmra.mrb[0].mxu0 %vm661_vm1, %v637_v22  ;;  %3033 = vmatprep.subr.bf16.mxu1 %v3851_v0 }
 0x179   : > { %3029 = vmatprep.mubr.msk.bf16.mxu0 %vm3852_vm0, %v3851_v0 }
 0x24b   : > { %v699_v26 = vpop.f32.mrb[0].mxu0 }
 0x24c   : > { %v4391_v27 = vadd.f32 %v2908_v25, %v699_v26  ;;  %v3015_v28 = vpop.f32.mrb[1].mxu0 }
 0x24d   : > { %v702_v29 = vpop.f32.mrb[2].mxu0 }
 0x24e   : > { %v708_v30 = vand.u32 2139095040, %v4391_v27  ;;  %v3016_v31 = vpop.f32.mrb[3].mxu0  ;;  %v705_v35 = vand.u32 2147483647, %v4391_v27  ;;  %vm707_vm9 = vcmp.lt.s32.totalorder %v4391_v27, 0  ;;  %vm797_vm14 = vweird.f32 %v4391_v27 }
 0x250   : > { %v709_v32 = vshrl.u32 %v708_v30, 23  ;;  %v712_v38 = vand.u32 8388607, %v705_v35  ;;  %vm706_vm10 = vcmp.le.f32.partialorder %v705_v35, 0.7853982 }
 0x252   : > { %v2912_v33 = vadd.s32 4294967169, %v709_v32  ;;  %v713_v57 = vor.u32 8388608, %v712_v38 }
 0x254   : > { %v715_v34 = vadd.s32 1, %v2912_v33  ;;  %v753_v26 = vshll.u32 %v713_v57, 8 }
 0x256   : > { %vm716_vm2 = vcmp.gt.s32.totalorder %v715_v34, 0 }
 0x257   : > { %v717_v36 = vsel %vm716_vm2, %v715_v34, 0 }
 0x258   : > { %v719_v37 = vand.u32 31, %v717_v36  ;;  %v718_v40 = vshrl.u32 %v717_v36, 5 }
 0x25a   : > { %v720_v39 = vsub.s32 32, %v719_v37  ;;  %v722_v42 = vshll.u32 %v3853_v41, %v719_v37  ;;  %v725_v44 = vshll.u32 %v3854_v43, %v719_v37  ;;  %v728_v48 = vshll.u32 %v3855_v46, %v719_v37 }
 0x25b   : > { %v731_v51 = vshll.u32 %v3856_v49, %v719_v37  ;;  %v734_v54 = vshll.u32 %v3857_v52, %v719_v37  ;;  %vm737_vm3 = vcmp.lt.s32.totalorder %v718_v40, 1  ;;  %vm740_vm4 = vcmp.lt.s32.totalorder %v718_v40, 4 }
 0x25c   : > { %v723_v45 = vshrl.u32 %v3854_v43, %v720_v39  ;;  %v726_v47 = vshrl.u32 %v3855_v46, %v720_v39  ;;  %v729_v50 = vshrl.u32 %v3856_v49, %v720_v39  ;;  %v732_v53 = vshrl.u32 %v3857_v52, %v720_v39 }
 0x25d   : > { %v735_v56 = vshrl.u32 %v3858_v55, %v720_v39  ;;  %v721_v21 = vshrl.u32 %v3853_v41, %v720_v39  ;;  %vm739_vm5 = vcmp.lt.s32.totalorder %v718_v40, 3  ;;  %vm738_vm6 = vcmp.lt.s32.totalorder %v718_v40, 2 }
 0x25e   : > { %v724_v58 = vor.u32 %v723_v45, %v722_v42  ;;  %v727_v59 = vor.u32 %v726_v47, %v725_v44  ;;  %v730_v60 = vor.u32 %v729_v50, %v728_v48  ;;  %v733_v61 = vor.u32 %v732_v53, %v731_v51 }
 0x25f   : > { %v736_v62 = vor.u32 %v735_v56, %v734_v54 }
 0x260   : > { %v742_v63 = vsel %vm740_vm4, %v730_v60, 2102212464  ;;  %v745_v19 = vsel %vm737_vm3, %v724_v58, %v727_v59  ;;  %v749_v20 = vsel %vm737_vm3, %v727_v59, %v730_v60  ;;  %v746_v22 = vsel %vm740_vm4, %v733_v61, 920167782 }
 0x261   : > { %v750_v23 = vsel %vm740_vm4, %v736_v62, 1326507024  ;;  %v747_v24 = vsel %vm739_vm5, %v730_v60, %v746_v22  ;;  %v741_v28 = vsel %vm737_vm3, %v721_v21, %v724_v58  ;;  %v743_v29 = vsel %vm739_vm5, %v727_v59, %v742_v63 }
 0x262   : > { %v751_v25 = vsel %vm739_vm5, %v733_v61, %v750_v23  ;;  %v748_v30 = vsel %vm738_vm6, %v745_v19, %v747_v24  ;;  %v744_v37 = vsel %vm738_vm6, %v741_v28, %v743_v29 }
 0x263   : > { %v752_v31 = vsel %vm738_vm6, %v749_v20, %v751_v25  ;;  %v4411_v34 = vmul.u32.u64.low %v753_v26, %v748_v30  ;;  %v4412_v36 = vmul.u32.u64.high %v753_v26, %v748_v30, %v4411_v34  ;;  %v760_v39 = vmul.u32 %v753_v26, %v744_v37 }
 0x264   : > { %v4408_v32 = vmul.u32.u64.low %v753_v26, %v752_v31  ;;  %v4409_v33 = vmul.u32.u64.high %v753_v26, %v752_v31, %v4408_v32 }
 0x265   : > { %v763_v38 = vadd.s32 1, %v4412_v36 }
 0x266   : > { %vm762_vm7 = vc.u32 %v4409_v33, %v4411_v34  ;;  %v761_v57 = vadd.s32 %v4411_v34, %v4409_v33 }
 0x267   : > { %v764_v40 = vsel %vm762_vm7, %v763_v38, %v4412_v36 }
 0x268   : > { %v765_v42 = vadd.s32 %v764_v40, %v760_v39 }
 0x26a   : > { %v766_v44 = vadd.s32 536870912, %v765_v42 }
 0x26c   : > { %v767_v45 = vshrl.u32 %v766_v44, 30  ;;  %v3356_v44 = vld [vmem:[#allocation13] sm:$0xff]  }
 0x26d   : > { %3026 = vmatpush3.bf16.msra.mxu0 %v3356_v44 }
 0x26e   : > { %v768_v47 = vshll.u32 %v767_v45, 30  ;;  %v791_v24 = vsub.s32 4, %v767_v45  ;;  %3027 = vmatprep.subr.bf16.mxu0 %v3851_v0 }
 0x270   : > { %v769_v48 = vsub.s32 %v765_v42, %v768_v47  ;;  %v792_v28 = vsel %vm707_vm9, %v791_v24, %v767_v45  ;;  %v3357_v45 = vld [vmem:[#allocation13 + $0x8] sm:$0xff]   ;;  %v2916_v47 = vld [vmem:[#allocation12] ss:$0 sm:$0xff] }
 0x271   : > { %v794_v30 = vsel %vm706_vm10, 0, %v792_v28  ;;  %3028 = vmatpush3.bf16.msra.mxu0 %v3357_v45 }
 0x272   : > { %v771_v50 = vsub.s32 0, %v769_v48  ;;  %v798_v31 = vadd.s32 3, %v794_v30 }
 0x274   : > { %v2913_v51 = vmin.u32 %v771_v50, %v769_v48  ;;  %v799_v32 = vand.u32 3, %v798_v31 }
 0x276   : > { %v773_v53 = vclz %v2913_v51  ;;  %vm804_vm11 = vcmp.eq.s32.totalorder %v799_v32, 2  ;;  %vm801_vm12 = vcmp.eq.s32.totalorder %v799_v32, 0  ;;  %vm800_vm13 = vcmp.lt.s32.totalorder %v799_v32, 2 }
 0x278   : > { %v2914_v54 = vadd.s32 4294967294, %v773_v53 }
 0x27a   : > { %vm2915_vm8 = vcmp.lt.s32.totalorder %v2914_v54, 0 }
 0x27b   : > { %v776_v56 = vsel %vm2915_vm8, 0, %v2914_v54 }
 0x27c   : > { %v777_v58 = vsub.s32 32, %v776_v56  ;;  %v781_v59 = vsub.s32 4294967266, %v776_v56  ;;  %v778_v60 = vshll.u32 %v769_v48, %v776_v56 }
 0x27e   : > { %v779_v61 = vshrl.u32 %v761_v57, %v777_v58  ;;  %v782_v62 = vadd.s32 127, %v781_v59 }
 0x280   : > { %v780_v63 = vor.u32 %v779_v61, %v778_v60  ;;  %v783_v19 = vshll.u32 %v782_v62, 23 }
 0x282   : > { %v784_v20 = vor.u32 4788187, %v783_v19  ;;  %v787_v22 = vcvt.s32.f32 %v780_v63 }
 0x284   : > { %v785_v21 = vand.u32 2147483647, %v784_v20 }
 0x286   : > { %v788_v23 = vmul.f32 %v787_v22, %v785_v21 }
 0x288   : > { %v789_v25 = vxor.u32 2147483648, %v788_v23 }
 0x28a   : > { %v790_v26 = vsel %vm707_vm9, %v789_v25, %v788_v23 }
 0x28b   : > { %v793_v29 = vsel %vm706_vm10, %v4391_v27, %v790_v26 }
 0x28c   : > { %3366 = vcosq.f32 %v793_v29 }
 0x28d   : > { %3368 = vsinq.f32 %v793_v29 }
 0x296   : > { %v3367_v33 = vpop.eup %3366 }
 0x297   : > { %v3369_v34 = vpop.eup %3368  ;;  %v805_v36 = vxor.u32 2147483648, %v3367_v33 }
 0x298   : > { %v802_v37 = vxor.u32 2147483648, %v3369_v34 }
 0x299   : > { %v806_v38 = vsel %vm804_vm11, %v805_v36, %v3369_v34 }
 0x29a   : > { %v803_v39 = vsel %vm801_vm12, %v3367_v33, %v802_v37 }
 0x29b   : > { %v807_v35 = vsel %vm800_vm13, %v803_v39, %v806_v38 }
 0x29c   : > { %v808_v40 = vsel %vm797_vm14, nan, %v807_v35 }
 0x29d   : > { %v809_v42 = vpack.c.bf16 %v808_v40, %v808_v40 }
 0x29f   : > { %3022 = vmatmul.mubr.msk.bf16.vlgmr.msra.gmra.mrb[0].mxu1 %vm661_vm1, %v809_v42 }
 0x2a0   : > { %3037 = vmatprep.mubr.msk.bf16.mxu1 %vm3852_vm0, %v3851_v0 }
 0x372   : > { %v870_v48 = vpop.f32.mrb[0].mxu1 }
 0x373   : > { %v4427_v50 = vadd.f32 %v2916_v47, %v870_v48  ;;  %v3023_v51 = vpop.f32.mrb[1].mxu1 }
 0x374   : > { %v873_v27 = vpop.f32.mrb[2].mxu1 }
 0x375   : > { %v879_v53 = vand.u32 2139095040, %v4427_v50  ;;  %v3024_v54 = vpop.f32.mrb[3].mxu1  ;;  %v876_v59 = vand.u32 2147483647, %v4427_v50  ;;  %vm878_vm7 = vcmp.lt.s32.totalorder %v4427_v50, 0  ;;  %vm968_vm12 = vweird.f32 %v4427_v50 }
 0x377   : > { %v880_v56 = vshrl.u32 %v879_v53, 23  ;;  %v883_v62 = vand.u32 8388607, %v876_v59  ;;  %vm877_vm8 = vcmp.le.f32.partialorder %v876_v59, 0.7853982 }
 0x379   : > { %v2920_v57 = vadd.s32 4294967169, %v880_v56  ;;  %v884_v31 = vor.u32 8388608, %v883_v62 }
 0x37b   : > { %v886_v58 = vadd.s32 1, %v2920_v57  ;;  %v924_v48 = vshll.u32 %v884_v31, 8 }
 0x37d   : > { %vm887_vm15 = vcmp.gt.s32.totalorder %v886_v58, 0 }
 0x37e   : > { %v888_v60 = vsel %vm887_vm15, %v886_v58, 0 }
 0x37f   : > { %v890_v61 = vand.u32 31, %v888_v60  ;;  %v889_v19 = vshrl.u32 %v888_v60, 5 }
 0x381   : > { %v891_v63 = vsub.s32 32, %v890_v61  ;;  %v893_v20 = vshll.u32 %v3853_v41, %v890_v61  ;;  %v896_v21 = vshll.u32 %v3854_v43, %v890_v61  ;;  %v899_v24 = vshll.u32 %v3855_v46, %v890_v61 }
 0x382   : > { %v902_v26 = vshll.u32 %v3856_v49, %v890_v61  ;;  %v905_v29 = vshll.u32 %v3857_v52, %v890_v61  ;;  %vm908_vm0 = vcmp.lt.s32.totalorder %v889_v19, 1  ;;  %vm911_vm2 = vcmp.lt.s32.totalorder %v889_v19, 4 }
 0x383   : > { %v894_v22 = vshrl.u32 %v3854_v43, %v891_v63  ;;  %v897_v23 = vshrl.u32 %v3855_v46, %v891_v63  ;;  %v900_v25 = vshrl.u32 %v3856_v49, %v891_v63  ;;  %v903_v28 = vshrl.u32 %v3857_v52, %v891_v63 }
 0x384   : > { %v906_v30 = vshrl.u32 %v3858_v55, %v891_v63  ;;  %v892_v40 = vshrl.u32 %v3853_v41, %v891_v63  ;;  %vm910_vm3 = vcmp.lt.s32.totalorder %v889_v19, 3  ;;  %vm909_vm4 = vcmp.lt.s32.totalorder %v889_v19, 2 }
 0x385   : > { %v895_v32 = vor.u32 %v894_v22, %v893_v20  ;;  %v898_v33 = vor.u32 %v897_v23, %v896_v21  ;;  %v901_v34 = vor.u32 %v900_v25, %v899_v24  ;;  %v904_v36 = vor.u32 %v903_v28, %v902_v26 }
 0x386   : > { %v907_v37 = vor.u32 %v906_v30, %v905_v29 }
 0x387   : > { %v913_v38 = vsel %vm911_vm2, %v901_v34, 2102212464  ;;  %v916_v39 = vsel %vm908_vm0, %v895_v32, %v898_v33  ;;  %v920_v35 = vsel %vm908_vm0, %v898_v33, %v901_v34  ;;  %v917_v42 = vsel %vm911_vm2, %v904_v36, 920167782 }
 0x388   : > { %v921_v44 = vsel %vm911_vm2, %v907_v37, 1326507024  ;;  %v918_v45 = vsel %vm910_vm3, %v901_v34, %v917_v42  ;;  %v912_v51 = vsel %vm908_vm0, %v892_v40, %v895_v32  ;;  %v914_v27 = vsel %vm910_vm3, %v898_v33, %v913_v38 }
 0x389   : > { %v922_v47 = vsel %vm910_vm3, %v904_v36, %v921_v44  ;;  %v919_v53 = vsel %vm909_vm4, %v916_v39, %v918_v45  ;;  %v915_v61 = vsel %vm909_vm4, %v912_v51, %v914_v27 }
 0x38a   : > { %v923_v54 = vsel %vm909_vm4, %v920_v35, %v922_v47  ;;  %v4447_v58 = vmul.u32.u64.low %v924_v48, %v919_v53  ;;  %v4448_v60 = vmul.u32.u64.high %v924_v48, %v919_v53, %v4447_v58  ;;  %v931_v63 = vmul.u32 %v924_v48, %v915_v61 }
 0x38b   : > { %v4444_v56 = vmul.u32.u64.low %v924_v48, %v923_v54  ;;  %v4445_v57 = vmul.u32.u64.high %v924_v48, %v923_v54, %v4444_v56 }
 0x38c   : > { %v934_v62 = vadd.s32 1, %v4448_v60 }
 0x38d   : > { %vm933_vm5 = vc.u32 %v4445_v57, %v4447_v58  ;;  %v932_v31 = vadd.s32 %v4447_v58, %v4445_v57 }
 0x38e   : > { %v935_v19 = vsel %vm933_vm5, %v934_v62, %v4448_v60 }
 0x38f   : > { %v936_v20 = vadd.s32 %v935_v19, %v931_v63 }
 0x391   : > { %v937_v21 = vadd.s32 536870912, %v936_v20 }
 0x393   : > { %v938_v22 = vshrl.u32 %v937_v21, 30  ;;  %v3358_v21 = vld [vmem:[#allocation16] sm:$0xff]  }
 0x394   : > { %3034 = vmatpush3.bf16.msra.mxu1 %v3358_v21 }
 0x395   : > { %v939_v23 = vshll.u32 %v938_v22, 30  ;;  %v962_v45 = vsub.s32 4, %v938_v22  ;;  %3035 = vmatprep.subr.bf16.mxu1 %v3851_v0 }
 0x397   : > { %v940_v24 = vsub.s32 %v936_v20, %v939_v23  ;;  %v963_v51 = vsel %vm878_vm7, %v962_v45, %v938_v22  ;;  %v3359_v22 = vld [vmem:[#allocation16 + $0x8] sm:$0xff]   ;;  %v2924_v23 = vld [vmem:[#allocation15] ss:$0 sm:$0xff] }
 0x398   : > { %v965_v53 = vsel %vm877_vm8, 0, %v963_v51  ;;  %3036 = vmatpush3.bf16.msra.mxu1 %v3359_v22 }
 0x399   : > { %v942_v25 = vsub.s32 0, %v940_v24  ;;  %v969_v54 = vadd.s32 3, %v965_v53 }
 0x39b   : > { %v2921_v26 = vmin.u32 %v942_v25, %v940_v24  ;;  %v970_v56 = vand.u32 3, %v969_v54 }
 0x39d   : > { %v944_v28 = vclz %v2921_v26  ;;  %vm975_vm9 = vcmp.eq.s32.totalorder %v970_v56, 2  ;;  %vm972_vm10 = vcmp.eq.s32.totalorder %v970_v56, 0  ;;  %vm971_vm11 = vcmp.lt.s32.totalorder %v970_v56, 2 }
 0x39f   : > { %v2922_v29 = vadd.s32 4294967294, %v944_v28 }
 0x3a1   : > { %vm2923_vm6 = vcmp.lt.s32.totalorder %v2922_v29, 0 }
 0x3a2   : > { %v947_v30 = vsel %vm2923_vm6, 0, %v2922_v29 }
 0x3a3   : > { %v948_v32 = vsub.s32 32, %v947_v30  ;;  %v952_v33 = vsub.s32 4294967266, %v947_v30  ;;  %v949_v34 = vshll.u32 %v940_v24, %v947_v30 }
 0x3a5   : > { %v950_v36 = vshrl.u32 %v932_v31, %v948_v32  ;;  %v953_v37 = vadd.s32 127, %v952_v33 }
 0x3a7   : > { %v951_v38 = vor.u32 %v950_v36, %v949_v34  ;;  %v954_v39 = vshll.u32 %v953_v37, 23 }
 0x3a9   : > { %v955_v35 = vor.u32 4788187, %v954_v39  ;;  %v958_v42 = vcvt.s32.f32 %v951_v38 }
 0x3ab   : > { %v956_v40 = vand.u32 2147483647, %v955_v35 }
 0x3ad   : > { %v959_v44 = vmul.f32 %v958_v42, %v956_v40 }
 0x3af   : > { %v960_v47 = vxor.u32 2147483648, %v959_v44 }
 0x3b1   : > { %v961_v48 = vsel %vm878_vm7, %v960_v47, %v959_v44 }
 0x3b2   : > { %v964_v27 = vsel %vm877_vm8, %v4427_v50, %v961_v48 }
 0x3b3   : > { %3370 = vcosq.f32 %v964_v27 }
 0x3b4   : > { %3372 = vsinq.f32 %v964_v27 }
 0x3bd   : > { %v3371_v57 = vpop.eup %3370 }
 0x3be   : > { %v3373_v58 = vpop.eup %3372  ;;  %v976_v60 = vxor.u32 2147483648, %v3371_v57 }
 0x3bf   : > { %v973_v61 = vxor.u32 2147483648, %v3373_v58 }
 0x3c0   : > { %v977_v62 = vsel %vm975_vm9, %v976_v60, %v3373_v58 }
 0x3c1   : > { %v974_v63 = vsel %vm972_vm10, %v3371_v57, %v973_v61 }
 0x3c2   : > { %v978_v59 = vsel %vm971_vm11, %v974_v63, %v977_v62 }
 0x3c3   : > { %v979_v19 = vsel %vm968_vm12, nan, %v978_v59 }
 0x3c4   : > { %v980_v20 = vpack.c.bf16 %v979_v19, %v979_v19 }
 0x3c6   : > { %3030 = vmatmul.mubr.msk.bf16.vlgmr.msra.gmra.mrb[4].mxu0 %vm661_vm1, %v980_v20 }
 0x499   : > { %v1041_v24 = vpop.f32.mrb[4].mxu0 }
 0x49a   : > { %v4461_v25 = vadd.f32 %v2924_v23, %v1041_v24  ;;  %v3031_v26 = vpop.f32.mrb[5].mxu0 }
 0x49b   : > { %v1044_v28 = vpop.f32.mrb[6].mxu0 }
 0x49c   : > { %v1050_v29 = vand.u32 2139095040, %v4461_v25  ;;  %v3032_v50 = vpop.f32.mrb[7].mxu0  ;;  %v1047_v33 = vand.u32 2147483647, %v4461_v25  ;;  %vm1049_vm5 = vcmp.lt.s32.totalorder %v4461_v25, 0  ;;  %vm1139_vm10 = vweird.f32 %v4461_v25 }
 0x49e   : > { %v1051_v30 = vshrl.u32 %v1050_v29, 23  ;;  %v1054_v0 = vand.u32 8388607, %v1047_v33  ;;  %vm1048_vm6 = vcmp.le.f32.partialorder %v1047_v33, 0.7853982 }
 0x4a0   : > { %v2928_v31 = vadd.s32 4294967169, %v1051_v30  ;;  %v1055_v53 = vor.u32 8388608, %v1054_v0 }
 0x4a2   : > { %v1057_v32 = vadd.s32 1, %v2928_v31  ;;  %v1095_v23 = vshll.u32 %v1055_v53, 8 }
 0x4a4   : > { %vm1058_vm13 = vcmp.gt.s32.totalorder %v1057_v32, 0 }
 0x4a5   : > { %v1059_v34 = vsel %vm1058_vm13, %v1057_v32, 0 }
 0x4a6   : > { %v1061_v36 = vand.u32 31, %v1059_v34  ;;  %v1060_v38 = vshrl.u32 %v1059_v34, 5 }
 0x4a8   : > { %v1062_v37 = vsub.s32 32, %v1061_v36  ;;  %v1064_v39 = vshll.u32 %v3853_v41, %v1061_v36  ;;  %v1067_v35 = vshll.u32 %v3854_v43, %v1061_v36  ;;  %v1070_v44 = vshll.u32 %v3855_v46, %v1061_v36 }
 0x4a9   : > { %v1073_v47 = vshll.u32 %v3856_v49, %v1061_v36  ;;  %v1076_v51 = vshll.u32 %v3857_v52, %v1061_v36  ;;  %vm1079_vm14 = vcmp.lt.s32.totalorder %v1060_v38, 1  ;;  %vm1082_vm15 = vcmp.lt.s32.totalorder %v1060_v38, 4 }
 0x4aa   : > { %v1065_v40 = vshrl.u32 %v3854_v43, %v1062_v37  ;;  %v1068_v42 = vshrl.u32 %v3855_v46, %v1062_v37  ;;  %v1071_v45 = vshrl.u32 %v3856_v49, %v1062_v37  ;;  %v1074_v48 = vshrl.u32 %v3857_v52, %v1062_v37 }
 0x4ab   : > { %v1077_v27 = vshrl.u32 %v3858_v55, %v1062_v37  ;;  %v1063_v59 = vshrl.u32 %v3853_v41, %v1062_v37  ;;  %vm1081_vm0 = vcmp.lt.s32.totalorder %v1060_v38, 3  ;;  %vm1080_vm2 = vcmp.lt.s32.totalorder %v1060_v38, 2 }
 0x4ac   : > { %v1066_v54 = vor.u32 %v1065_v40, %v1064_v39  ;;  %v1069_v56 = vor.u32 %v1068_v42, %v1067_v35  ;;  %v1072_v57 = vor.u32 %v1071_v45, %v1070_v44  ;;  %v1075_v58 = vor.u32 %v1074_v48, %v1073_v47 }
 0x4ad   : > { %v1078_v60 = vor.u32 %v1077_v27, %v1076_v51 }
 0x4ae   : > { %v1084_v61 = vsel %vm1082_vm15, %v1072_v57, 2102212464  ;;  %v1087_v62 = vsel %vm1079_vm14, %v1066_v54, %v1069_v56  ;;  %v1091_v63 = vsel %vm1079_vm14, %v1069_v56, %v1072_v57  ;;  %v1088_v19 = vsel %vm1082_vm15, %v1075_v58, 920167782 }
 0x4af   : > { %v1092_v20 = vsel %vm1082_vm15, %v1078_v60, 1326507024  ;;  %v1089_v21 = vsel %vm1081_vm0, %v1072_v57, %v1088_v19  ;;  %v1083_v24 = vsel %vm1079_vm14, %v1063_v59, %v1066_v54  ;;  %v1085_v26 = vsel %vm1081_vm0, %v1069_v56, %v1084_v61 }
 0x4b0   : > { %v1093_v22 = vsel %vm1081_vm0, %v1075_v58, %v1092_v20  ;;  %v1090_v28 = vsel %vm1080_vm2, %v1087_v62, %v1089_v21  ;;  %v1086_v34 = vsel %vm1080_vm2, %v1083_v24, %v1085_v26 }
 0x4b1   : > { %v1094_v29 = vsel %vm1080_vm2, %v1091_v63, %v1093_v22  ;;  %v4481_v31 = vmul.u32.u64.low %v1095_v23, %v1090_v28  ;;  %v4482_v32 = vmul.u32.u64.high %v1095_v23, %v1090_v28, %v4481_v31  ;;  %v1102_v0 = vmul.u32 %v1095_v23, %v1086_v34 }
 0x4b2   : > { %v4478_v50 = vmul.u32.u64.low %v1095_v23, %v1094_v29  ;;  %v4479_v30 = vmul.u32.u64.high %v1095_v23, %v1094_v29, %v4478_v50 }
 0x4b3   : > { %v1105_v36 = vadd.s32 1, %v4482_v32 }
 0x4b4   : > { %vm1104_vm3 = vc.u32 %v4479_v30, %v4481_v31  ;;  %v1103_v27 = vadd.s32 %v4481_v31, %v4479_v30 }
 0x4b5   : > { %v1106_v37 = vsel %vm1104_vm3, %v1105_v36, %v4482_v32 }
 0x4b6   : > { %v1107_v38 = vadd.s32 %v1106_v37, %v1102_v0 }
 0x4b8   : > { %v1108_v39 = vadd.s32 536870912, %v1107_v38 }
 0x4ba   : > { %v1109_v35 = vshrl.u32 %v1108_v39, 30  ;;  %v3362_v39 = vld [vmem:[%s5099_s21 + $0x4] ss:$8 sps:$4 sm:$0xff]  }
 0x4bb   : > { %1362 = vmatprep.subr.bf16.mxu0 %v3362_v39 }
 0x4bc   : > { %v1110_v40 = vshll.u32 %v1109_v35, 30  ;;  %v1133_v20 = vsub.s32 4, %v1109_v35 }
 0x4be   : > { %v1111_v42 = vsub.s32 %v1107_v38, %v1110_v40  ;;  %v1134_v23 = vsel %vm1049_vm5, %v1133_v20, %v1109_v35  ;;  %v3360_v38 = vld [vmem:[%s5099_s21] ss:$8 sps:$4 sm:$0xff]   ;;  %v3365_v35 = vld [vmem:[%s5099_s21 + $0x14] ss:$8 sps:$4 sm:$0xff]   ;;  %v3859_v40 = vmov 0  }
 0x4bf   : > { %v1136_v26 = vsel %vm1048_vm6, 0, %v1134_v23  ;;  %1394 = vmatprep.mubr.bf16.mxu0 %v3859_v40  ;;  %1363 = vmatpush1.bf16.msra.mxu0 %v3360_v38 }
 0x4c0   : > { %v1113_v44 = vsub.s32 0, %v1111_v42  ;;  %v1140_v28 = vadd.s32 3, %v1136_v26  ;;  %1364 = vmatprep.subr.bf16.mxu0 %v3365_v35 }
 0x4c2   : > { %v2929_v45 = vmin.u32 %v1113_v44, %v1111_v42  ;;  %v1141_v29 = vand.u32 3, %v1140_v28 }
 0x4c4   : > { %v1115_v47 = vclz %v2929_v45  ;;  %vm1146_vm7 = vcmp.eq.s32.totalorder %v1141_v29, 2  ;;  %vm1143_vm8 = vcmp.eq.s32.totalorder %v1141_v29, 0  ;;  %vm1142_vm9 = vcmp.lt.s32.totalorder %v1141_v29, 2 }
 0x4c6   : > { %v2930_v48 = vadd.s32 4294967294, %v1115_v47 }
 0x4c8   : > { %vm2931_vm4 = vcmp.lt.s32.totalorder %v2930_v48, 0 }
 0x4c9   : > { %v1118_v51 = vsel %vm2931_vm4, 0, %v2930_v48 }
 0x4ca   : > { %v1119_v53 = vsub.s32 32, %v1118_v51  ;;  %v1123_v54 = vsub.s32 4294967266, %v1118_v51  ;;  %v1120_v56 = vshll.u32 %v1111_v42, %v1118_v51  ;;  %v2932_v42 = vld [vmem:[#allocation18] ss:$0 sm:$0xff] }
 0x4cc   : > { %v1121_v57 = vshrl.u32 %v1103_v27, %v1119_v53  ;;  %v1124_v58 = vadd.s32 127, %v1123_v54 }
 0x4ce   : > { %v1122_v60 = vor.u32 %v1121_v57, %v1120_v56  ;;  %v1125_v61 = vshll.u32 %v1124_v58, 23 }
 0x4d0   : > { %v1126_v62 = vor.u32 4788187, %v1125_v61  ;;  %v1129_v59 = vcvt.s32.f32 %v1122_v60 }
 0x4d2   : > { %v1127_v63 = vand.u32 2147483647, %v1126_v62 }
 0x4d4   : > { %v1130_v19 = vmul.f32 %v1129_v59, %v1127_v63 }
 0x4d6   : > { %v1131_v21 = vxor.u32 2147483648, %v1130_v19 }
 0x4d8   : > { %v1132_v22 = vsel %vm1049_vm5, %v1131_v21, %v1130_v19 }
 0x4d9   : > { %v1135_v24 = vsel %vm1048_vm6, %v4461_v25, %v1132_v22  ;;  %v3363_v25 = vld [vmem:[%s5099_s21 + $0x10] ss:$8 sps:$4 sm:$0xff]  }
 0x4da   : > { %3374 = vcosq.f32 %v1135_v24  ;;  %1365 = vmatpush1.bf16.msra.mxu0 %v3363_v25 }
 0x4db   : > { %3376 = vsinq.f32 %v1135_v24 }
 0x4e4   : > { %v3375_v50 = vpop.eup %3374 }
 0x4e5   : > { %v3377_v30 = vpop.eup %3376  ;;  %v1147_v31 = vxor.u32 2147483648, %v3375_v50 }
 0x4e6   : > { %v1144_v32 = vxor.u32 2147483648, %v3377_v30 }
 0x4e7   : > { %v1148_v34 = vsel %vm1146_vm7, %v1147_v31, %v3377_v30 }
 0x4e8   : > { %v1145_v36 = vsel %vm1143_vm8, %v3375_v50, %v1144_v32 }
 0x4e9   : > { %v1149_v33 = vsel %vm1142_vm9, %v1145_v36, %v1148_v34 }
 0x4ea   : > { %v1150_v0 = vsel %vm1139_vm10, nan, %v1149_v33 }
 0x4eb   : > { %v1151_v37 = vpack.c.bf16 %v1150_v0, %v1150_v0 }
 0x4ed   : > { %3038 = vmatmul.mubr.msk.bf16.vlgmr.msra.gmra.mrb[4].mxu1 %vm661_vm1, %v1151_v37 }
 0x5c0   : > { %v1212_v44 = vpop.f32.mrb[4].mxu1 }
 0x5c1   : > { %v4506_v45 = vadd.f32 %v2932_v42, %v1212_v44  ;;  %v3039_v47 = vpop.f32.mrb[5].mxu1 }
 0x5c2   : > { %v1215_v48 = vpop.f32.mrb[6].mxu1 }
 0x5c3   : > { %v1221_v51 = vand.u32 2139095040, %v4506_v45  ;;  %v3040_v27 = vpop.f32.mrb[7].mxu1  ;;  %v1218_v57 = vand.u32 2147483647, %v4506_v45  ;;  %vm1220_vm3 = vcmp.lt.s32.totalorder %v4506_v45, 0  ;;  %vm1310_vm8 = vweird.f32 %v4506_v45 }
 0x5c5   : > { %v1222_v53 = vshrl.u32 %v1221_v51, 23  ;;  %v1225_v61 = vand.u32 8388607, %v1218_v57  ;;  %vm1219_vm4 = vcmp.le.f32.partialorder %v1218_v57, 0.7853982 }
 0x5c7   : > { %v2936_v54 = vadd.s32 4294967169, %v1222_v53  ;;  %v1226_v50 = vor.u32 8388608, %v1225_v61 }
 0x5c9   : > { %v1228_v56 = vadd.s32 1, %v2936_v54 }
 0x5cb   : > { %vm1229_vm11 = vcmp.gt.s32.totalorder %v1228_v56, 0 }
 0x5cc   : > { %v1230_v58 = vsel %vm1229_vm11, %v1228_v56, 0 }
 0x5cd   : > { %v1232_v60 = vand.u32 31, %v1230_v58  ;;  %v1231_v63 = vshrl.u32 %v1230_v58, 5 }
 0x5cf   : > { %v1233_v62 = vsub.s32 32, %v1232_v60  ;;  %v1235_v59 = vshll.u32 %v3853_v41, %v1232_v60  ;;  %v1238_v19 = vshll.u32 %v3854_v43, %v1232_v60  ;;  %v1241_v22 = vshll.u32 %v3855_v46, %v1232_v60 }
 0x5d0   : > { %v1244_v24 = vshll.u32 %v3856_v49, %v1232_v60  ;;  %v1247_v28 = vshll.u32 %v3857_v52, %v1232_v60  ;;  %vm1250_vm12 = vcmp.lt.s32.totalorder %v1231_v63, 1  ;;  %vm1253_vm13 = vcmp.lt.s32.totalorder %v1231_v63, 4 }
 0x5d1   : > { %v1236_v20 = vshrl.u32 %v3854_v43, %v1233_v62  ;;  %v1239_v21 = vshrl.u32 %v3855_v46, %v1233_v62  ;;  %v1242_v23 = vshrl.u32 %v3856_v49, %v1233_v62  ;;  %v1245_v26 = vshrl.u32 %v3857_v52, %v1233_v62 }
 0x5d2   : > { %v1248_v29 = vshrl.u32 %v3858_v55, %v1233_v62  ;;  %v1234_v0 = vshrl.u32 %v3853_v41, %v1233_v62  ;;  %vm1252_vm14 = vcmp.lt.s32.totalorder %v1231_v63, 3  ;;  %vm1251_vm15 = vcmp.lt.s32.totalorder %v1231_v63, 2 }
 0x5d3   : > { %v1237_v30 = vor.u32 %v1236_v20, %v1235_v59  ;;  %v1240_v31 = vor.u32 %v1239_v21, %v1238_v19  ;;  %v1243_v32 = vor.u32 %v1242_v23, %v1241_v22  ;;  %v1246_v34 = vor.u32 %v1245_v26, %v1244_v24 }
 0x5d4   : > { %v1249_v43 = vor.u32 %v1248_v29, %v1247_v28  ;;  %v1266_v55 = vshll.u32 %v1226_v50, 8 }
 0x5d5   : > { %v1255_v36 = vsel %vm1253_vm13, %v1243_v32, 2102212464  ;;  %v1258_v46 = vsel %vm1250_vm12, %v1237_v30, %v1240_v31  ;;  %v1262_v33 = vsel %vm1250_vm12, %v1240_v31, %v1243_v32  ;;  %v1259_v49 = vsel %vm1253_vm13, %v1246_v34, 920167782 }
 0x5d6   : > { %v1263_v37 = vsel %vm1253_vm13, %v1249_v43, 1326507024  ;;  %v1260_v52 = vsel %vm1252_vm14, %v1243_v32, %v1259_v49  ;;  %v1254_v39 = vsel %vm1250_vm12, %v1234_v0, %v1237_v30  ;;  %v1256_v35 = vsel %vm1252_vm14, %v1240_v31, %v1255_v36 }
 0x5d7   : > { %v1264_v38 = vsel %vm1252_vm14, %v1246_v34, %v1263_v37  ;;  %v1261_v40 = vsel %vm1251_vm15, %v1258_v46, %v1260_v52  ;;  %v1257_v51 = vsel %vm1251_vm15, %v1254_v39, %v1256_v35 }
 0x5d8   : > { %v1265_v25 = vsel %vm1251_vm15, %v1262_v33, %v1264_v38  ;;  %v4526_v47 = vmul.u32.u64.low %v1266_v55, %v1261_v40  ;;  %v4527_v48 = vmul.u32.u64.high %v1266_v55, %v1261_v40, %v4526_v47  ;;  %v1273_v27 = vmul.u32 %v1266_v55, %v1257_v51 }
 0x5d9   : > { %v4523_v42 = vmul.u32.u64.low %v1266_v55, %v1265_v25  ;;  %v4524_v44 = vmul.u32.u64.high %v1266_v55, %v1265_v25, %v4523_v42 }
 0x5da   : > { %v1276_v41 = vadd.s32 1, %v4527_v48 }
 0x5db   : > { %vm1275_vm0 = vc.u32 %v4524_v44, %v4526_v47  ;;  %v1274_v21 = vadd.s32 %v4526_v47, %v4524_v44  ;;  %v5057_v47 = vlaneseq }
 0x5dc   : > { %v1277_v53 = vsel %vm1275_vm0, %v1276_v41, %v4527_v48 }
 0x5dd   : > { %v1278_v54 = vadd.s32 %v1277_v53, %v1273_v27  ;;  %v4540_v48 = vshrl.u32 %v5057_v47, 7 }
 0x5df   : > { %v1279_v56 = vadd.s32 536870912, %v1278_v54  ;;  %v1428_v51 = vadd.s32 8, %v4540_v48  ;;  %v5056_v41 = vcvt.s32.f32 %v4540_v48 }
 0x5e1   : > { %v1280_v58 = vshrl.u32 %v1279_v56, 30  ;;  %v1430_v27 = vcvt.s32.f32 %v1428_v51  ;;  %v4546_v53 = vmul.f32 8.0, %v5056_v41  ;;  %v1327_v56 = vld [vmem:[%s5102_s3] sm:$0x3] }
 0x5e3   : > { %v1281_v60 = vshll.u32 %v1280_v58, 30  ;;  %v1304_v43 = vsub.s32 4, %v1280_v58  ;;  %5100 = vst [vmem:[#allocation35_spill] sm:$0xff] %v4546_v53 }
 0x5e5   : > { %v1282_v61 = vsub.s32 %v1278_v54, %v1281_v60  ;;  %v1305_v33 = vsel %vm1220_vm3, %v1304_v43, %v1280_v58  ;;  %v4548_v54 = vmul.f32 8.0, %v1430_v27  ;;  %v5058_v58 = vsub.s32 1, %v4540_v48 }
 0x5e6   : > { %v1307_v49 = vsel %vm1219_vm4, 0, %v1305_v33 }
 0x5e7   : > { %v1284_v62 = vsub.s32 0, %v1282_v61  ;;  %v1311_v37 = vadd.s32 3, %v1307_v49  ;;  %5101 = vst [vmem:[#allocation36_spill] sm:$0xff] %v4548_v54 }
 0x5e9   : > { %v2937_v63 = vmin.u32 %v1284_v62, %v1282_v61  ;;  %v1312_v52 = vand.u32 3, %v1311_v37 }
 0x5eb   : > { %v1286_v59 = vclz %v2937_v63  ;;  %vm1317_vm5 = vcmp.eq.s32.totalorder %v1312_v52, 2  ;;  %vm1314_vm6 = vcmp.eq.s32.totalorder %v1312_v52, 0  ;;  %vm1313_vm7 = vcmp.lt.s32.totalorder %v1312_v52, 2 }
 0x5ed   : > { %v2938_v19 = vadd.s32 4294967294, %v1286_v59 }
 0x5ef   : > { %vm2939_vm2 = vcmp.lt.s32.totalorder %v2938_v19, 0 }
 0x5f0   : > { %v1289_v20 = vsel %vm2939_vm2, 0, %v2938_v19 }
 0x5f1   : > { %v1290_v22 = vsub.s32 32, %v1289_v20  ;;  %v1294_v23 = vsub.s32 4294967266, %v1289_v20  ;;  %v1291_v24 = vshll.u32 %v1282_v61, %v1289_v20  ;;  %v1336_v61 = vrot.slane %v1327_v56, %v5058_v58 }
 0x5f3   : > { %v1292_v26 = vshrl.u32 %v1274_v21, %v1290_v22  ;;  %v1295_v28 = vadd.s32 127, %v1294_v23 }
 0x5f5   : > { %v1293_v29 = vor.u32 %v1292_v26, %v1291_v24  ;;  %v1296_v50 = vshll.u32 %v1295_v28, 23 }
 0x5f7   : > { %v1297_v30 = vor.u32 4788187, %v1296_v50  ;;  %v1300_v32 = vcvt.s32.f32 %v1293_v29 }
 0x5f9   : > { %v1298_v31 = vand.u32 2147483647, %v1297_v30 }
 0x5fb   : > { %v1301_v34 = vmul.f32 %v1300_v32, %v1298_v31 }
 0x5fd   : > { %v1302_v36 = vxor.u32 2147483648, %v1301_v34 }
 0x5ff   : > { %v1303_v46 = vsel %vm1220_vm3, %v1302_v36, %v1301_v34 }
 0x600   : > { %v1306_v0 = vsel %vm1219_vm4, %v4506_v45, %v1303_v46  ;;  %v4551_v45 = vsub.s32 0, %v4540_v48 }
 0x601   : > { %3378 = vcosq.f32 %v1306_v0 }
 0x602   : > { %3380 = vsinq.f32 %v1306_v0  ;;  %v1332_v60 = vrot.slane %v1327_v56, %v4551_v45 }
 0x60b   : > { %v3379_v38 = vpop.eup %3378 }
 0x60c   : > { %v3381_v55 = vpop.eup %3380  ;;  %v1318_v39 = vxor.u32 2147483648, %v3379_v38 }
 0x60d   : > { %v1315_v35 = vxor.u32 2147483648, %v3381_v55 }
 0x60e   : > { %v1319_v40 = vsel %vm1317_vm5, %v1318_v39, %v3381_v55 }
 0x60f   : > { %v1316_v25 = vsel %vm1314_vm6, %v3379_v38, %v1315_v35 }
 0x610   : > { %v1320_v57 = vsel %vm1313_vm7, %v1316_v25, %v1319_v40 }
 0x611   : > { %v1321_v42 = vsel %vm1310_vm8, nan, %v1320_v57 }
 0x612   : > { %v1322_v44 = vpack.c.bf16 %v1321_v42, %v1321_v42 }
 0x614   : > { %2944 = vmatmul.mubr.msk.bf16.vlgmr.msra.gmra.mrb[8].mxu0 %vm661_vm1, %v1322_v44 }
 0x6e7   : > { %v1396_v62 = vpop.f32.mrb[8].mxu0 }
 0x6e8   : > { %v1397_v63 = vadd.f32 %v1396_v62, %v1332_v60  ;;  %v1398_v59 = vpop.f32.mrb[9].mxu0 }
 0x6e9   : > { %v1399_v19 = vadd.f32 %v1398_v59, %v1336_v61  ;;  %v1400_v20 = vpop.f32.mrb[10].mxu0 }
 0x6ea   : > { %3382 = vtanh.f32 %v1397_v63  ;;  %v1401_v21 = vpop.f32.mrb[11].mxu0 }
 0x6eb   : > { %v1406_v22 = vmax.f32 %v1399_v19, 0.0 }
 0x6ed   : > { %1407 = vst [vmem:[#allocation2 + $0x8] sm:$0xff] %v1406_v22 }
 0x6f4   : > { %v3383_v23 = vpop.eup %3382 }
 0x6f5   : > { %v1404_v24 = vmul.f32 64.0, %v3383_v23 }
 0x6f7   : > { %1405 = vst [vmem:[#allocation2] sm:$0xff] %v1404_v24 }
 0x6f8 LB: >> { %v5059_v26 = vmov 0.0|0.0   ;;  %s1439_s25 = sshra.s32 %s3833_s23, 3  ;;  %s1442_s27 = sand.u32 7, %s3833_s23  ;;  %v5103_v53 = vld [vmem:[#allocation35_spill] sm:$0xff]  ;;  %v5104_v41 = vcvt.s32.f32 %v4540_v48  ;;  %v5105_v54 = vld [vmem:[#allocation36_spill] sm:$0xff]  ;;  %vm3867_vm5 = vmmov 0   ;;  %s3833_s23 = sphi %s4564_s23, %s1438_s23  }
 0x6f9   : >> { %3095 = vmatprep.subr.bf16.mxu1 %v5059_v26  ;;  %3083 = vmatprep.subr.bf16.mxu0 %v5059_v26  ;;  %s2976_s17 = sshll.u32 %s1439_s25, 4  ;;  %v3861_v19 = vmov 683565275   ;;  %v3862_v21 = vmov 2475754826   ;;  %s3870_s22 = smov 72  }
 0x6fa   : >> { %s4573_s20 = sadd.s32 %s2976_s17, %s1442_s27  ;;  %v3863_v23 = vmov 2131351028   ;;  %s1438_s23 = sadd.s32 1, %s3833_s23  }
 0x6fb   : >> { %s1446_s14 = scalar_lea.vmem [#allocation2], %s4573_s20  ;;  %s2580_s10 = scalar_lea.vmem [#allocation3], %s4573_s20 }
 0x6fc   : >> { %p1435_p2 = scmp.ge.s32.totalorder %s1438_s23, 8  }
 0x6fd   : > { %s5112_s0 = sld [smem:[#allocation33_spill]] (%p1435_p2)  ;;  %s2692_s23 = sshll.u32 (%p1435_p2), %s4562_s1, 4  ;;  %s4988_s23 = int_to_ptr.vmem [resolvable:$true] %s2692_s23 }
 0x6fe   : >> { %v1447_v28 = vld [vmem:[%s1446_s14] ss:$8 sm:$0x3]  ;;  %s5113_s17 = sld [smem:[#allocation42_spill]] (%p1435_p2)  ;;  %p5114_p6 = scmp.ne.s32.totalorder (%p1435_p2), %s5080_s26, 0 }
 0x6ff   : >> { %v1448_v29 = vmul.f32 0.09666439, %v1447_v28  ;;  %v3864_v28 = vmov 2102212464  }
 0x701   : >> { %v1453_v50 = vrot.slane %v1448_v29, %v4551_v45 }
 0x703   : >> { %v4580_v30 = vmul.f32 %v1453_v50, %v5103_v53  ;;  %v4584_v31 = vmul.f32 %v1453_v50, %v5104_v41  ;;  %v4587_v32 = vmul.f32 %v1453_v50, %v5105_v54  ;;  %v3865_v50 = vmov 920167782   ;;  %s2973_s3 = sshll.u32 (%p1435_p2), %s5112_s0, 7 }
 0x704   : > { %s4986_s20 = scalar_lea.hbm (%p1435_p2), %s5113_s17, %s2973_s3 }
 0x705   : >> { %v1458_v34 = vand.u32 2147483647, %v4580_v30  ;;  %v1461_v43 = vand.u32 2139095040, %v4580_v30  ;;  %v1872_v36 = vand.u32 2147483647, %v4584_v31  ;;  %v1875_v46 = vand.u32 2139095040, %v4584_v31 }
 0x706   : >> { %v1564_v52 = vand.u32 2139095040, %v4587_v32 }
 0x707   : >> { %v1462_v33 = vshrl.u32 %v1461_v43, 23  ;;  %v1465_v0 = vand.u32 8388607, %v1458_v34  ;;  %v1876_v49 = vshrl.u32 %v1875_v46, 23  ;;  %v1879_v37 = vand.u32 8388607, %v1872_v36 }
 0x708   : >> { %v1565_v39 = vshrl.u32 %v1564_v52, 23 }
 0x709   : >> { %v2947_v38 = vadd.s32 4294967169, %v1462_v33  ;;  %v2963_v55 = vadd.s32 4294967169, %v1876_v49  ;;  %v1466_v40 = vor.u32 8388608, %v1465_v0  ;;  %v1880_v25 = vor.u32 8388608, %v1879_v37 }
 0x70a   : >> { %v2951_v42 = vadd.s32 4294967169, %v1565_v39 }
 0x70b   : >> { %v1468_v35 = vadd.s32 1, %v2947_v38  ;;  %v1882_v57 = vadd.s32 1, %v2963_v55  ;;  %v4598_v60 = vshll.u32 %v1466_v40, 8  ;;  %v4600_v62 = vshll.u32 %v1880_v25, 8 }
 0x70c   : >> { %v4602_v63 = vadd.s32 1, %v2951_v42  ;;  %v3866_v38 = vmov 1326507024  }
 0x70d   : >> { %vm1469_vm1 = vcmp.gt.s32.totalorder %v1468_v35, 0  ;;  %vm1883_vm9 = vcmp.gt.s32.totalorder %v1882_v57, 0 }
 0x70e   : >> { %v1470_v44 = vsel %vm1469_vm1, %v1468_v35, 0  ;;  %v1884_v56 = vsel %vm1883_vm9, %v1882_v57, 0  ;;  %vm1572_vm14 = vcmp.gt.s32.totalorder %v4602_v63, 0 }
 0x70f   : >> { %v1471_v51 = vshrl.u32 %v1470_v44, 5  ;;  %v1472_v27 = vand.u32 31, %v1470_v44  ;;  %v1886_v61 = vand.u32 31, %v1884_v56  ;;  %v4609_v46 = vshrl.u32 %v1884_v56, 5 }
 0x711   : >> { %v1473_v59 = vsub.s32 32, %v1472_v27  ;;  %v1475_v20 = vshll.u32 %v3861_v19, %v1472_v27  ;;  %v1478_v22 = vshll.u32 %v3862_v21, %v1472_v27  ;;  %v1481_v24 = vshll.u32 %v3863_v23, %v1472_v27 }
 0x712   : >> { %v1484_v29 = vshll.u32 %v3864_v28, %v1472_v27  ;;  %v1487_v43 = vshll.u32 %v3865_v50, %v1472_v27  ;;  %vm1490_vm10 = vcmp.lt.s32.totalorder %v1471_v51, 1  ;;  %vm1491_vm11 = vcmp.lt.s32.totalorder %v1471_v51, 2 }
 0x713   : >> { %v1474_v33 = vshrl.u32 %v3861_v19, %v1473_v59  ;;  %v1476_v0 = vshrl.u32 %v3862_v21, %v1473_v59  ;;  %v1479_v49 = vshrl.u32 %v3863_v23, %v1473_v59  ;;  %v1482_v37 = vshrl.u32 %v3864_v28, %v1473_v59 }
 0x714   : >> { %v1485_v52 = vshrl.u32 %v3865_v50, %v1473_v59  ;;  %v1488_v55 = vshrl.u32 %v3866_v38, %v1473_v59  ;;  %vm1493_vm12 = vcmp.lt.s32.totalorder %v1471_v51, 4  ;;  %v1887_v25 = vsub.s32 32, %v1886_v61 }
 0x715   : >> { %v1477_v39 = vor.u32 %v1476_v0, %v1475_v20  ;;  %v1480_v35 = vor.u32 %v1479_v49, %v1478_v22  ;;  %v1483_v40 = vor.u32 %v1482_v37, %v1481_v24  ;;  %vm1492_vm13 = vcmp.lt.s32.totalorder %v1471_v51, 3 }
 0x716   : >> { %v1486_v57 = vor.u32 %v1485_v52, %v1484_v29  ;;  %v1489_v42 = vor.u32 %v1488_v55, %v1487_v43  ;;  %v1889_v44 = vshll.u32 %v3861_v19, %v1886_v61  ;;  %v1892_v20 = vshll.u32 %v3862_v21, %v1886_v61 }
 0x717   : >> { %v1494_v27 = vsel %vm1490_vm10, %v1474_v33, %v1477_v39  ;;  %v1495_v56 = vsel %vm1493_vm12, %v1483_v40, 2102212464  ;;  %v1498_v41 = vsel %vm1490_vm10, %v1477_v39, %v1480_v35  ;;  %v1502_v47 = vsel %vm1490_vm10, %v1480_v35, %v1483_v40 }
 0x718   : >> { %v1496_v58 = vsel %vm1492_vm13, %v1480_v35, %v1495_v56  ;;  %v1499_v59 = vsel %vm1493_vm12, %v1486_v57, 920167782  ;;  %v1503_v26 = vsel %vm1493_vm12, %v1489_v42, 1326507024  ;;  %v1888_v29 = vshrl.u32 %v3861_v19, %v1887_v25 }
 0x719   : >> { %v1500_v22 = vsel %vm1492_vm13, %v1483_v40, %v1499_v59  ;;  %v1504_v24 = vsel %vm1492_vm13, %v1486_v57, %v1503_v26  ;;  %v1890_v43 = vshrl.u32 %v3862_v21, %v1887_v25  ;;  %v1497_v33 = vsel %vm1491_vm11, %v1494_v27, %v1496_v58 }
 0x71a   : >> { %v1501_v0 = vsel %vm1491_vm11, %v1498_v41, %v1500_v22  ;;  %v1505_v49 = vsel %vm1491_vm11, %v1502_v47, %v1504_v24  ;;  %v1893_v37 = vshrl.u32 %v3863_v23, %v1887_v25  ;;  %v1895_v57 = vshll.u32 %v3863_v23, %v1886_v61 }
 0x71b   : >> { %v4630_v52 = vmul.u32.u64.low %v4598_v60, %v1505_v49  ;;  %v4631_v55 = vmul.u32.u64.high %v4598_v60, %v1505_v49, %v4630_v52  ;;  %v4634_v39 = vmul.u32.u64.low %v4598_v60, %v1501_v0  ;;  %v4635_v35 = vmul.u32.u64.high %v4598_v60, %v1501_v0, %v4634_v39 }
 0x71c   : >> { %v1891_v26 = vor.u32 %v1890_v43, %v1889_v44  ;;  %v1894_v40 = vor.u32 %v1893_v37, %v1892_v20  ;;  %v1896_v58 = vshrl.u32 %v3864_v28, %v1887_v25  ;;  %v1898_v41 = vshll.u32 %v3864_v28, %v1886_v61 }
 0x71d   : >> { %v1899_v47 = vshrl.u32 %v3865_v50, %v1887_v25  ;;  %v1901_v51 = vshll.u32 %v3865_v50, %v1886_v61  ;;  %v1902_v42 = vshrl.u32 %v3866_v38, %v1887_v25  ;;  %v1513_v27 = vmul.u32 %v4598_v60, %v1497_v33 }
 0x71e   : >> { %v1897_v56 = vor.u32 %v1896_v58, %v1895_v57  ;;  %vm1904_vm15 = vcmp.lt.s32.totalorder %v4609_v46, 1  ;;  %vm1905_vm0 = vcmp.lt.s32.totalorder %v4609_v46, 2  ;;  %vm1515_vm2 = vc.u32 %v4631_v55, %v4634_v39 }
 0x71f   : >> { %v1516_v44 = vadd.s32 1, %v4635_v35  ;;  %v1900_v59 = vor.u32 %v1899_v47, %v1898_v41  ;;  %vm1906_vm3 = vcmp.lt.s32.totalorder %v4609_v46, 3  ;;  %v1903_v20 = vor.u32 %v1902_v42, %v1901_v51 }
 0x720   : >> { %vm1907_vm4 = vcmp.lt.s32.totalorder %v4609_v46, 4  ;;  %v1908_v61 = vsel %vm1904_vm15, %v1888_v29, %v1891_v26  ;;  %v1912_v25 = vsel %vm1904_vm15, %v1891_v26, %v1894_v40  ;;  %v1916_v43 = vsel %vm1904_vm15, %v1894_v40, %v1897_v56 }
 0x721   : >> { %v1517_v60 = vsel %vm1515_vm2, %v1516_v44, %v4635_v35  ;;  %v1909_v22 = vsel %vm1907_vm4, %v1897_v56, 2102212464  ;;  %v1913_v24 = vsel %vm1907_vm4, %v1900_v59, 920167782  ;;  %v1917_v37 = vsel %vm1907_vm4, %v1903_v20, 1326507024 }
 0x722   : >> { %v1518_v33 = vadd.s32 %v1517_v60, %v1513_v27  ;;  %v1910_v0 = vsel %vm1906_vm3, %v1894_v40, %v1909_v22  ;;  %v1914_v49 = vsel %vm1906_vm3, %v1897_v56, %v1913_v24  ;;  %v1918_v58 = vsel %vm1906_vm3, %v1900_v59, %v1917_v37 }
 0x723   : >> { %v1911_v52 = vsel %vm1905_vm0, %v1908_v61, %v1910_v0  ;;  %v1915_v57 = vsel %vm1905_vm0, %v1912_v25, %v1914_v49  ;;  %v1573_v29 = vsel %vm1572_vm14, %v4602_v63, 0  ;;  %v1919_v35 = vsel %vm1905_vm0, %v1916_v43, %v1918_v58 }
 0x724   : >> { %v1519_v26 = vadd.s32 536870912, %v1518_v33  ;;  %v4663_v41 = vmul.u32.u64.low %v4600_v62, %v1915_v57  ;;  %v4664_v40 = vmul.u32.u64.high %v4600_v62, %v1915_v57, %v4663_v41  ;;  %v1575_v27 = vand.u32 31, %v1573_v29 }
 0x725   : >> { %v4668_v47 = vmul.u32.u64.low %v4600_v62, %v1919_v35  ;;  %v4669_v51 = vmul.u32.u64.high %v4600_v62, %v1919_v35, %v4668_v47  ;;  %v1927_v56 = vmul.u32 %v4600_v62, %v1911_v52  ;;  %v5061_v63 = vmov 0.0  }
 0x726   : >> { %v4671_v42 = vshrl.u32 %v1519_v26, 30  ;;  %3080 = vmatprep.mubr.msk.f32.mxu1 %vm3867_vm5, %v5061_v63  ;;  %3059 = vmatprep.mubr.msk.f32.mxu0 %vm3867_vm5, %v5061_v63  ;;  %v1930_v44 = vadd.s32 1, %v4664_v40  ;;  %v1576_v59 = vsub.s32 32, %v1575_v27  ;;  %v5063_v25 = vand.u32 2147483647, %v4587_v32 }
 0x727   : >> { %vm1929_vm6 = vc.u32 %v4669_v51, %v4663_v41  ;;  %v4682_v60 = vshrl.u32 %v1573_v29, 5  ;;  %v1578_v24 = vshll.u32 %v3861_v19, %v1575_v27  ;;  %v1581_v0 = vshll.u32 %v3862_v21, %v1575_v27 }
 0x728   : >> { %v1521_v46 = vshll.u32 %v4671_v42, 30  ;;  %v1931_v61 = vsel %vm1929_vm6, %v1930_v44, %v4664_v40  ;;  %v1579_v43 = vshrl.u32 %v3862_v21, %v1576_v59  ;;  %v1582_v37 = vshrl.u32 %v3863_v23, %v1576_v59 }
 0x729   : >> { %v1932_v62 = vadd.s32 %v1931_v61, %v1927_v56  ;;  %v1584_v52 = vshll.u32 %v3863_v23, %v1575_v27  ;;  %v1568_v58 = vand.u32 8388607, %v5063_v25  ;;  %v1514_v29 = vadd.s32 %v4634_v39, %v4631_v55 }
 0x72a   : >> { %v1522_v20 = vsub.s32 %v1518_v33, %v1521_v46  ;;  %v1585_v33 = vshrl.u32 %v3864_v28, %v1576_v59  ;;  %v1577_v35 = vshrl.u32 %v3861_v19, %v1576_v59  ;;  %v1587_v21 = vshll.u32 %v3864_v28, %v1575_v27 }
 0x72b   : >> { %v1933_v49 = vadd.s32 536870912, %v1932_v62  ;;  %v1588_v47 = vshrl.u32 %v3865_v50, %v1576_v59  ;;  %vm1593_vm7 = vcmp.lt.s32.totalorder %v4682_v60, 1  ;;  %vm1596_vm8 = vcmp.lt.s32.totalorder %v4682_v60, 4 }
 0x72c   : >> { %v1524_v22 = vsub.s32 0, %v1522_v20  ;;  %v1580_v56 = vor.u32 %v1579_v43, %v1578_v24  ;;  %v1583_v46 = vor.u32 %v1582_v37, %v1581_v0  ;;  %v1586_v44 = vor.u32 %v1585_v33, %v1584_v52 }
 0x72d   : >> { %v4694_v26 = vshrl.u32 %v1933_v49, 30  ;;  %v1589_v55 = vor.u32 %v1588_v47, %v1587_v21  ;;  %v1590_v39 = vshll.u32 %v3865_v50, %v1575_v27  ;;  %v1591_v19 = vshrl.u32 %v3866_v38, %v1576_v59 }
 0x72e   : >> { %v2948_v57 = vmin.u32 %v1524_v22, %v1522_v20  ;;  %vm1595_vm1 = vcmp.lt.s32.totalorder %v4682_v60, 3  ;;  %v1597_v28 = vsel %vm1593_vm7, %v1577_v35, %v1580_v56  ;;  %v1598_v49 = vsel %vm1596_vm8, %v1586_v44, 2102212464 }
 0x72f   : >> { %v1935_v23 = vshll.u32 %v4694_v26, 30  ;;  %vm1594_vm10 = vcmp.lt.s32.totalorder %v4682_v60, 2  ;;  %v1599_v24 = vsel %vm1595_vm1, %v1583_v46, %v1598_v49  ;;  %v1602_v50 = vsel %vm1596_vm8, %v1589_v55, 920167782 }
 0x730   : >> { %v1526_v40 = vclz %v2948_v57  ;;  %v1569_v59 = vor.u32 8388608, %v1568_v58  ;;  %v1592_v52 = vor.u32 %v1591_v19, %v1590_v39  ;;  %v1601_v57 = vsel %vm1593_vm7, %v1580_v56, %v1583_v46 }
 0x731   : >> { %v1936_v22 = vsub.s32 %v1932_v62, %v1935_v23  ;;  %v1600_v62 = vsel %vm1594_vm10, %v1597_v28, %v1599_v24  ;;  %v1603_v35 = vsel %vm1595_vm1, %v1586_v44, %v1602_v50  ;;  %v1605_v58 = vsel %vm1593_vm7, %v1583_v46, %v1586_v44 }
 0x732   : >> { %v2949_v61 = vadd.s32 4294967294, %v1526_v40  ;;  %v1609_v23 = vshll.u32 %v1569_v59, 8  ;;  %v1606_v39 = vsel %vm1596_vm8, %v1592_v52, 1326507024  ;;  %v1544_v56 = vsub.s32 4, %v4671_v42 }
 0x733   : >> { %v1938_v38 = vsub.s32 0, %v1936_v22  ;;  %v1607_v46 = vsel %vm1595_vm1, %v1589_v55, %v1606_v39  ;;  %vm1460_vm12 = vcmp.lt.s32.totalorder %v4580_v30, 0  ;;  %vm1459_vm13 = vcmp.le.f32.partialorder %v1458_v34, 0.7853982 }
 0x734   : >> { %vm2950_vm9 = vcmp.lt.s32.totalorder %v2949_v61, 0  ;;  %v1608_v44 = vsel %vm1594_vm10, %v1605_v58, %v1607_v46  ;;  %v1958_v39 = vsub.s32 4, %v4694_v26  ;;  %vm1874_vm15 = vcmp.lt.s32.totalorder %v4584_v31, 0 }
 0x735   : >> { %v1529_v27 = vsel %vm2950_vm9, 0, %v2949_v61  ;;  %v2964_v33 = vmin.u32 %v1938_v38, %v1936_v22  ;;  %vm1873_vm0 = vcmp.le.f32.partialorder %v1872_v36, 0.7853982  ;;  %vm1550_vm8 = vweird.f32 %v4580_v30 }
 0x736   : >> { %v1530_v43 = vsub.s32 32, %v1529_v27  ;;  %v1531_v0 = vshll.u32 %v1522_v20, %v1529_v27  ;;  %v1534_v37 = vsub.s32 4294967266, %v1529_v27  ;;  %v1604_v20 = vsel %vm1594_vm10, %v1601_v57, %v1603_v35 }
 0x737   : >> { %v1940_v47 = vclz %v2964_v33  ;;  %v4733_v50 = vmul.u32.u64.low %v1609_v23, %v1604_v20  ;;  %v4734_v27 = vmul.u32.u64.high %v1609_v23, %v1604_v20, %v4733_v50  ;;  %vm1964_vm1 = vweird.f32 %v4584_v31 }
 0x738   : >> { %v1532_v21 = vshrl.u32 %v1514_v29, %v1530_v43  ;;  %v1535_v40 = vadd.s32 127, %v1534_v37  ;;  %v1928_v29 = vadd.s32 %v4663_v41, %v4669_v51  ;;  %v1616_v51 = vmul.u32 %v1609_v23, %v1600_v62 }
 0x739   : >> { %v2965_v19 = vadd.s32 4294967294, %v1940_v47  ;;  %v1619_v57 = vadd.s32 1, %v4734_v27 }
 0x73a   : >> { %v1533_v61 = vor.u32 %v1532_v21, %v1531_v0  ;;  %v1536_v28 = vshll.u32 %v1535_v40, 23  ;;  %v4736_v43 = vmul.u32.u64.low %v1609_v23, %v1608_v44  ;;  %v4737_v0 = vmul.u32.u64.high %v1609_v23, %v1608_v44, %v4736_v43 }
 0x73b   : >> { %vm2966_vm11 = vcmp.lt.s32.totalorder %v2965_v19, 0  ;;  %v1545_v21 = vsel %vm1460_vm12, %v1544_v56, %v4671_v42 }
 0x73c   : >> { %v1537_v49 = vor.u32 4788187, %v1536_v28  ;;  %v1540_v24 = vcvt.s32.f32 %v1533_v61  ;;  %v1943_v59 = vsel %vm2966_vm11, 0, %v2965_v19  ;;  %v4745_v40 = vadd.s32 %v4733_v50, %v4737_v0 }
 0x73d   : >> { %v1944_v37 = vsub.s32 32, %v1943_v59  ;;  %v1945_v52 = vshll.u32 %v1936_v22, %v1943_v59  ;;  %v1948_v33 = vsub.s32 4294967266, %v1943_v59  ;;  %vm1618_vm14 = vc.u32 %v4737_v0, %v4733_v50 }
 0x73e   : >> { %v1538_v38 = vand.u32 2147483647, %v1537_v49  ;;  %v1620_v58 = vsel %vm1618_vm14, %v1619_v57, %v4734_v27  ;;  %v1547_v61 = vsel %vm1459_vm13, 0, %v1545_v21  ;;  %v3869_v27 = vmov 1966171168  }
 0x73f   : >> { %v1946_v60 = vshrl.u32 %v1928_v29, %v1944_v37  ;;  %v1949_v55 = vadd.s32 127, %v1948_v33  ;;  %v1621_v23 = vadd.s32 %v1620_v58, %v1616_v51  ;;  %v1757_v19 = vadd.s32 3, %v1547_v61 }
 0x740   : >> { %v1541_v41 = vmul.f32 %v1540_v24, %v1538_v38  ;;  %v1959_v29 = vsel %vm1874_vm15, %v1958_v39, %v4694_v26  ;;  %v1551_v44 = vand.u32 3, %v1547_v61  ;;  %v2083_v38 = vunpack.c.l.s4 %v3869_v27 }
 0x741   : >> { %v1947_v22 = vor.u32 %v1946_v60, %v1945_v52  ;;  %v1950_v47 = vshll.u32 %v1949_v55, 23  ;;  %v1622_v42 = vadd.s32 536870912, %v1621_v23  ;;  %v1758_v59 = vand.u32 3, %v1757_v19 }
 0x742   : >> { %v1542_v35 = vxor.u32 2147483648, %v1541_v41  ;;  %v1961_v37 = vsel %vm1873_vm0, 0, %v1959_v29  ;;  %vm1556_vm2 = vcmp.eq.s32.totalorder %v1551_v44, 2  ;;  %v2084_v26 = vunpack.c.0.s8 %v2083_v38 }
 0x743   : >> { %v1951_v28 = vor.u32 4788187, %v1950_v47  ;;  %v1954_v20 = vcvt.s32.f32 %v1947_v22  ;;  %v4751_v49 = vshrl.u32 %v1622_v42, 30  ;;  %vm1763_vm3 = vcmp.eq.s32.totalorder %v1758_v59, 2 }
 0x744   : >> { %v1543_v62 = vsel %vm1460_vm12, %v1542_v35, %v1541_v41  ;;  %v2068_v51 = vadd.s32 3, %v1961_v37  ;;  %vm1553_vm4 = vcmp.eq.s32.totalorder %v1551_v44, 0  ;;  %vm1760_vm5 = vcmp.eq.s32.totalorder %v1758_v59, 0 }
 0x745   : >> { %v1546_v34 = vsel %vm1459_vm13, %v4580_v30, %v1543_v62  ;;  %v1952_v56 = vand.u32 2147483647, %v1951_v28  ;;  %v1624_v46 = vshll.u32 %v4751_v49, 30  ;;  %v1965_v57 = vand.u32 3, %v1961_v37 }
 0x746   : >> { %3384 = vcosq.f32 %v1546_v34  ;;  %vm1552_vm6 = vcmp.lt.s32.totalorder %v1551_v44, 2  ;;  %vm1759_vm7 = vcmp.lt.s32.totalorder %v1758_v59, 2  ;;  %v4766_v58 = vsub.s32 %v2084_v26, %v4540_v48 }
 0x747   : >> { %3386 = vsinq.f32 %v1546_v34  ;;  %v1955_v24 = vmul.f32 %v1954_v20, %v1952_v56  ;;  %v4758_v43 = vsub.s32 %v1621_v23, %v1624_v46  ;;  %v2069_v34 = vand.u32 3, %v2068_v51 }
 0x748   : >> { %vm1966_vm9 = vcmp.lt.s32.totalorder %v1965_v57, 2  ;;  %vm1967_vm10 = vcmp.eq.s32.totalorder %v1965_v57, 0  ;;  %vm1970_vm11 = vcmp.eq.s32.totalorder %v1965_v57, 2 }
 0x749   : >> { %v1956_v50 = vxor.u32 2147483648, %v1955_v24  ;;  %v1627_v33 = vsub.s32 0, %v4758_v43  ;;  %vm2070_vm13 = vcmp.lt.s32.totalorder %v2069_v34, 2  ;;  %vm2071_vm14 = vcmp.eq.s32.totalorder %v2069_v34, 0 }
 0x74b   : >> { %v1957_v0 = vsel %vm1874_vm15, %v1956_v50, %v1955_v24  ;;  %v2952_v36 = vmin.u32 %v1627_v33, %v4758_v43  ;;  %vm2074_vm15 = vcmp.eq.s32.totalorder %v2069_v34, 2 }
 0x74c   : >> { %v1960_v52 = vsel %vm1873_vm0, %v4584_v31, %v1957_v0  ;;  %vm1563_vm0 = vcmp.lt.s32.totalorder %v4587_v32, 0 }
 0x74d   : >> { %3388 = vcosq.f32 %v1960_v52  ;;  %v1629_v21 = vclz %v2952_v36 }
 0x74e   : >> { %3390 = vsinq.f32 %v1960_v52 }
 0x74f   : >> { %v2953_v61 = vadd.s32 4294967294, %v1629_v21 }
 0x750   : >> { %v3385_v41 = vpop.eup %3384 }
 0x751   : >> { %v3387_v60 = vpop.eup %3386  ;;  %v1557_v55 = vxor.u32 2147483648, %v3385_v41  ;;  %vm2954_vm12 = vcmp.lt.s32.totalorder %v2953_v61, 0 }
 0x752   : >> { %v1554_v35 = vxor.u32 2147483648, %v3387_v60  ;;  %v4771_v29 = vsel %vm2954_vm12, 0, %v2953_v61 }
 0x753   : >> { %v1558_v22 = vsel %vm1556_vm2, %v1557_v55, %v3387_v60  ;;  %v1765_v47 = vsel %vm1763_vm3, %v1557_v55, %v3387_v60  ;;  %v5107_v54 = vsub.s32 32, %v4771_v29 }
 0x754   : >> { %v1555_v62 = vsel %vm1553_vm4, %v3385_v41, %v1554_v35  ;;  %v1762_v23 = vsel %vm1760_vm5, %v3385_v41, %v1554_v35 }
 0x755   : >> { %v1559_v28 = vsel %vm1552_vm6, %v1555_v62, %v1558_v22  ;;  %v1766_v20 = vsel %vm1759_vm7, %v1762_v23, %v1765_v47 }
 0x756   : >> { %v1560_v39 = vsel %vm1550_vm8, nan, %v1559_v28  ;;  %v1767_v42 = vsel %vm1550_vm8, nan, %v1766_v20 }
 0x757   : >> { %v2081_v30 = vcombine.high %v1560_v39, %v1560_v39  ;;  %v2088_v56 = vrot.slane %v1560_v39, %v4766_v58  ;;  %v2200_v19 = vcombine.high %v1767_v42, %v1767_v42  ;;  %v2207_v24 = vrot.slane %v1767_v42, %v4766_v58  ;;  %v3389_v46 = vpop.eup %3388 }
 0x758   : >> { %v3391_v59 = vpop.eup %3390  ;;  %v1971_v0 = vxor.u32 2147483648, %v3389_v46 }
 0x759   : >> { %v2096_v44 = vcombine.high %v2088_v56, %v2088_v56  ;;  %v2104_v50 = vrot.slane %v2088_v56, %v4766_v58  ;;  %v2215_v27 = vcombine.high %v2207_v24, %v2207_v24  ;;  %v2223_v38 = vrot.slane %v2207_v24, %v4766_v58 }
 0x75a   : >> { %v2095_v37 = vrot.slane %v2081_v30, %v4766_v58  ;;  %v4777_v52 = vrot.slane %v2200_v19, %v4766_v58  ;;  %v1968_v26 = vxor.u32 2147483648, %v3391_v59  ;;  %v1972_v60 = vsel %vm1970_vm11, %v1971_v0, %v3391_v59 }
 0x75b   : >> { %v2118_v41 = vrot.slane %v2096_v44, %v4766_v58  ;;  %v2147_v51 = vrot.slane %v2104_v50, %v4551_v45  ;;  %v2237_v36 = vrot.slane %v2215_v27, %v4766_v58  ;;  %v2076_v55 = vsel %vm2074_vm15, %v1971_v0, %v3391_v59 }
 0x75c   : >> { %v2266_v35 = vrot.slane %v2223_v38, %v4551_v45  ;;  %v2126_v21 = vcombine.high %v2104_v50, %v2104_v50  ;;  %v1969_v22 = vsel %vm1967_vm10, %v3389_v46, %v1968_v26  ;;  %v2073_v47 = vsel %vm2071_vm14, %v3389_v46, %v1968_v26 }
 0x75d   : >> { %v2151_v62 = vrot.slane %v2118_v41, %v4551_v45  ;;  %v2270_v23 = vrot.slane %v2237_v36, %v4551_v45  ;;  %v1973_v61 = vsel %vm1966_vm9, %v1969_v22, %v1972_v60  ;;  %v2077_v28 = vsel %vm2070_vm13, %v2073_v47, %v2076_v55 }
 0x75e   : >> { %v2128_v20 = vcombine.high %v2118_v41, %v2118_v41  ;;  %v2155_v39 = vrot.slane %v2126_v21, %v4551_v45  ;;  %v4795_v42 = vsel %vm1964_vm1, nan, %v1973_v61  ;;  %v4799_v30 = vsel %vm1964_vm1, nan, %v2077_v28 }
 0x75f   : >> { %v2245_v56 = vcombine.high %v2223_v38, %v2223_v38  ;;  %v2247_v19 = vcombine.high %v2237_v36, %v2237_v36  ;;  %v2189_v24 = vmul.f32 %v2147_v51, %v4795_v42  ;;  %v2190_v57 = vmul.f32 %v2151_v62, %v4795_v42 }
 0x760   : >> { %v2308_v34 = vmul.f32 %v2266_v35, %v4799_v30  ;;  %v2309_v46 = vmul.f32 %v2270_v23, %v4799_v30  ;;  %v2326_v44 = vmul.f32 %v2266_v35, %v4795_v42  ;;  %v2327_v50 = vmul.f32 %v2270_v23, %v4795_v42 }
 0x761   : >> { %v2335_v27 = vmul.f32 %v2147_v51, %v4799_v30  ;;  %v2336_v31 = vmul.f32 %v2151_v62, %v4799_v30  ;;  %v2159_v0 = vrot.slane %v2128_v20, %v4551_v45  ;;  %v2191_v26 = vmul.f32 %v2155_v39, %v4795_v42 }
 0x762   : >> { %v4809_v59 = vsub.f32 %v2189_v24, %v2308_v34  ;;  %v4811_v38 = vsub.f32 %v2190_v57, %v2309_v46  ;;  %v2274_v60 = vrot.slane %v2245_v56, %v4551_v45  ;;  %v2278_v55 = vrot.slane %v2247_v19, %v4551_v45 }
 0x763   : >> { %v4815_v41 = vadd.f32 %v2335_v27, %v2326_v44  ;;  %v4817_v36 = vadd.f32 %v2336_v31, %v2327_v50  ;;  %v2192_v21 = vmul.f32 %v2159_v0, %v4795_v42  ;;  %v2337_v22 = vmul.f32 %v2155_v39, %v4799_v30 }
 0x764   : >> { %v2456_v51 = vmul.f32 %v4809_v59, %v4365_v10  ;;  %v2457_v35 = vmul.f32 %v4811_v38, %v4367_v11  ;;  %v2310_v23 = vmul.f32 %v2274_v60, %v4799_v30  ;;  %v2311_v61 = vmul.f32 %v2278_v55, %v4799_v30 }
 0x765   : >> { %v2465_v47 = vmul.f32 %v4815_v41, %v4347_v1  ;;  %v2466_v62 = vmul.f32 %v4817_v36, %v4349_v2  ;;  %v2328_v28 = vmul.f32 %v2274_v60, %v4795_v42  ;;  %v2329_v20 = vmul.f32 %v2278_v55, %v4795_v42 }
 0x766   : >> { %v2338_v56 = vmul.f32 %v2159_v0, %v4799_v30  ;;  %v2097_v19 = vcombine.high %v2095_v37, %v2095_v37  ;;  %v4836_v39 = vsub.f32 %v2191_v26, %v2310_v23  ;;  %v4838_v34 = vsub.f32 %v2192_v21, %v2311_v61 }
 0x767   : >> { %v2474_v24 = vsub.f32 %v2456_v51, %v2465_v47  ;;  %v2475_v57 = vsub.f32 %v2457_v35, %v2466_v62  ;;  %v4840_v46 = vadd.f32 %v2337_v22, %v2328_v28  ;;  %v2111_v50 = vrot.slane %v2095_v37, %v4766_v58 }
 0x768   : >> { %v4842_v44 = vadd.f32 %v2338_v56, %v2329_v20  ;;  %v2125_v27 = vrot.slane %v2097_v19, %v4766_v58  ;;  %v2458_v60 = vmul.f32 %v4836_v39, %v4369_v12  ;;  %v2459_v0 = vmul.f32 %v4838_v34, %v4371_v13 }
 0x769   : >> { %v3096_v31 = vpack.c.bf16 %v2475_v57, %v2474_v24  ;;  %v2216_v26 = vcombine.high %v4777_v52, %v4777_v52  ;;  %v2467_v55 = vmul.f32 %v4840_v46, %v4351_v3  ;;  %v2163_v37 = vrot.slane %v2111_v50, %v4551_v45 }
 0x76a   : >> { %v2468_v51 = vmul.f32 %v4842_v44, %v4353_v4  ;;  %v2167_v35 = vrot.slane %v2125_v27, %v4551_v45  ;;  %v2230_v21 = vrot.slane %v4777_v52, %v4766_v58  ;;  %v2127_v47 = vcombine.high %v2111_v50, %v2111_v50 }
 0x76b   : >> { %3097 = vmatpush3.bf16.xpose.msra.mxu1 %v3096_v31  ;;  %v2244_v22 = vrot.slane %v2216_v26, %v4766_v58  ;;  %v2129_v62 = vcombine.high %v2125_v27, %v2125_v27  ;;  %v5106_v23 = vmov 0.0|0.0   ;;  %v2476_v61 = vsub.f32 %v2458_v60, %v2467_v55 }
 0x76c   : >> { %3098 = vmatprep.subr.bf16.mxu1 %v5106_v23  ;;  %v2477_v28 = vsub.f32 %v2459_v0, %v2468_v51  ;;  %v2193_v20 = vmul.f32 %v2163_v37, %v4795_v42  ;;  %v2194_v56 = vmul.f32 %v2167_v35, %v4795_v42  ;;  %v2282_v19 = vrot.slane %v2230_v21, %v4551_v45 }
 0x76d   : >> { %v2286_v24 = vrot.slane %v2244_v22, %v4551_v45  ;;  %v2339_v57 = vmul.f32 %v2163_v37, %v4799_v30  ;;  %v2340_v52 = vmul.f32 %v2167_v35, %v4799_v30  ;;  %v2171_v50 = vrot.slane %v2127_v47, %v4551_v45 }
 0x76e   : >> { %v3099_v31 = vpack.c.bf16 %v2477_v28, %v2476_v61  ;;  %v2175_v27 = vrot.slane %v2129_v62, %v4551_v45  ;;  %v2246_v26 = vcombine.high %v2230_v21, %v2230_v21  ;;  %v2312_v60 = vmul.f32 %v2282_v19, %v4799_v30 }
 0x76f   : >> { %v2313_v0 = vmul.f32 %v2286_v24, %v4799_v30  ;;  %v2330_v55 = vmul.f32 %v2282_v19, %v4795_v42  ;;  %v2331_v51 = vmul.f32 %v2286_v24, %v4795_v42  ;;  %v2195_v63 = vmul.f32 %v2171_v50, %v4795_v42 }
 0x770   : >> { %v2196_v37 = vmul.f32 %v2175_v27, %v4795_v42  ;;  %v2248_v25 = vcombine.high %v2244_v22, %v2244_v22  ;;  %v2290_v35 = vrot.slane %v2246_v26, %v4551_v45  ;;  %v4877_v61 = vsub.f32 %v2193_v20, %v2312_v60 }
 0x771   : >> { %v2322_v47 = vsub.f32 %v2194_v56, %v2313_v0  ;;  %v4879_v62 = vadd.f32 %v2339_v57, %v2330_v55  ;;  %v4881_v21 = vadd.f32 %v2340_v52, %v2331_v51  ;;  %v2341_v33 = vmul.f32 %v2171_v50, %v4799_v30 }
 0x772   : >> { %v2294_v28 = vrot.slane %v2248_v25, %v4551_v45  ;;  %v2314_v19 = vmul.f32 %v2290_v35, %v4799_v30  ;;  %v2332_v24 = vmul.f32 %v2290_v35, %v4795_v42  ;;  %v2460_v22 = vmul.f32 %v4877_v61, %v4373_v14 }
 0x773   : >> { %3100 = vmatpush3.bf16.xpose.msra.mxu1 %v3099_v31  ;;  %v2461_v20 = vmul.f32 %v2322_v47, %v4375_v15  ;;  %v2469_v56 = vmul.f32 %v4879_v62, %v4355_v5  ;;  %v2470_v57 = vmul.f32 %v4881_v21, %v4357_v6  ;;  %v2342_v31 = vmul.f32 %v2175_v27, %v4799_v30 }
 0x774   : >> { %3101 = vmatprep.subr.bf16.mxu1 %v5106_v23  ;;  %v2315_v25 = vmul.f32 %v2294_v28, %v4799_v30  ;;  %v4896_v52 = vsub.f32 %v2195_v63, %v2314_v19  ;;  %v2333_v50 = vmul.f32 %v2294_v28, %v4795_v42  ;;  %v4900_v0 = vadd.f32 %v2341_v33, %v2332_v24 }
 0x775   : >> { %v2478_v26 = vsub.f32 %v2460_v22, %v2469_v56  ;;  %v2479_v60 = vsub.f32 %v2461_v20, %v2470_v57  ;;  %v1634_v55 = vshll.u32 %v4758_v43, %v4771_v29  ;;  %v1635_v63 = vshrl.u32 %v4745_v40, %v5107_v54 }
 0x776   : >> { %v2324_v51 = vsub.f32 %v2196_v37, %v2315_v25  ;;  %v2351_v35 = vadd.f32 %v2342_v31, %v2333_v50  ;;  %v2462_v53 = vmul.f32 %v4896_v52, %v4377_v16  ;;  %v2471_v27 = vmul.f32 %v4900_v0, %v4359_v7 }
 0x777   : >> { %v3102_v19 = vpack.c.bf16 %v2479_v60, %v2478_v26  ;;  %v1637_v28 = vsub.s32 4294967266, %v4771_v29  ;;  %v2353_v33 = vmul.f32 %v4809_v59, %v4347_v1  ;;  %v1636_v24 = vor.u32 %v1635_v63, %v1634_v55 }
 0x778   : >> { %v2463_v43 = vmul.f32 %v2324_v51, %v4379_v17  ;;  %v2472_v37 = vmul.f32 %v2351_v35, %v4361_v8  ;;  %v2354_v22 = vmul.f32 %v4811_v38, %v4349_v2  ;;  %v2362_v54 = vmul.f32 %v4815_v41, %v4365_v10  ;;  %v2593_v2 = vld [vmem:[#allocation22 + $0x40] sm:$0xff] (%p1435_p2) }
 0x779   : >> { %v1638_v20 = vadd.s32 127, %v1637_v28  ;;  %v2363_v40 = vmul.f32 %v4817_v36, %v4367_v11  ;;  %v2480_v56 = vsub.f32 %v2462_v53, %v2471_v27  ;;  %v2355_v59 = vmul.f32 %v4836_v39, %v4351_v3  ;;  %v2594_v3 = vld [vmem:[#allocation22 + $0x48] sm:$0xff] (%p1435_p2)  ;;  %v2599_v11 = vld [vmem:[#allocation22 + $0x70] sm:$0xff] (%p1435_p2) }
 0x77a   : >> { %v2481_v29 = vsub.f32 %v2463_v43, %v2472_v37  ;;  %v2356_v57 = vmul.f32 %v4838_v34, %v4353_v4  ;;  %v2371_v50 = vadd.f32 %v2362_v54, %v2353_v33  ;;  %v2364_v38 = vmul.f32 %v4840_v46, %v4369_v12  ;;  %v2600_v12 = vld [vmem:[#allocation22 + $0x78] sm:$0xff] (%p1435_p2) }
 0x77b   : >> { %3103 = vmatpush3.bf16.xpose.msra.mxu1 %v3102_v19  ;;  %v1639_v25 = vshll.u32 %v1638_v20, 23  ;;  %v2372_v31 = vadd.f32 %v2363_v40, %v2354_v22  ;;  %v2365_v41 = vmul.f32 %v4842_v44, %v4371_v13  ;;  %v1643_v36 = vcvt.s32.f32 %v1636_v24 }
 0x77c   : >> { %3104 = vmatprep.subr.bf16.mxu1 %v5106_v23  ;;  %v1647_v39 = vsub.s32 4, %v4751_v49  ;;  %v3105_v60 = vpack.c.bf16 %v2481_v29, %v2480_v56  ;;  %v2373_v34 = vadd.f32 %v2364_v38, %v2355_v59  ;;  %v5108_v19 = vand.u32 2147483647, %v4587_v32 }
 0x77d   : >> { %v1640_v53 = vor.u32 4788187, %v1639_v25  ;;  %v3084_v26 = vpack.c.bf16 %v2372_v31, %v2371_v50  ;;  %v2374_v63 = vadd.f32 %v2365_v41, %v2356_v57  ;;  %v2357_v27 = vmul.f32 %v4877_v61, %v4355_v5  ;;  %v2595_v5 = vld [vmem:[#allocation22 + $0x50] sm:$0xff] (%p1435_p2) }
 0x77e   : >> { %vm1562_vm2 = vcmp.le.f32.partialorder %v5108_v19, 0.7853982  ;;  %v1648_v44 = vsel %vm1563_vm0, %v1647_v39, %v4751_v49  ;;  %v2358_v28 = vmul.f32 %v2322_v47, %v4357_v6  ;;  %v2366_v37 = vmul.f32 %v4879_v62, %v4373_v14  ;;  %v2596_v6 = vld [vmem:[#allocation22 + $0x58] sm:$0xff] (%p1435_p2)  ;;  %v2601_v14 = vld [vmem:[#allocation22 + $0x80] sm:$0xff] (%p1435_p2) }
 0x77f   : >> { %v1641_v55 = vand.u32 2147483647, %v1640_v53  ;;  %3085 = vmatpush3.bf16.xpose.msra.mxu0 %v3084_v26  ;;  %v3087_v43 = vpack.c.bf16 %v2374_v63, %v2373_v34  ;;  %v2367_v24 = vmul.f32 %v4881_v21, %v4375_v15  ;;  %v5109_v22 = vmov 0.0   ;;  %v2602_v15 = vld [vmem:[#allocation22 + $0x88] sm:$0xff] (%p1435_p2) }
 0x780   : >> { %3086 = vmatprep.subr.bf16.mxu0 %v5106_v23  ;;  %v1650_v49 = vsel %vm1562_vm2, 0, %v1648_v44  ;;  %v2375_v61 = vadd.f32 %v2366_v37, %v2357_v27  ;;  %v2359_v62 = vmul.f32 %v4896_v52, %v4359_v7  ;;  %v2360_v21 = vmul.f32 %v2324_v51, %v4361_v8  ;;  %v2597_v8 = vld [vmem:[#allocation22 + $0x60] sm:$0xff] (%p1435_p2) }
 0x781   : >> { %v1644_v46 = vmul.f32 %v1643_v36, %v1641_v55  ;;  %v2376_v40 = vadd.f32 %v2367_v24, %v2358_v28  ;;  %v1861_v47 = vadd.s32 3, %v1650_v49  ;;  %v2368_v29 = vmul.f32 %v4900_v0, %v4377_v16 }
 0x782   : >> { %v2369_v59 = vmul.f32 %v2351_v35, %v4379_v17  ;;  %v1654_v57 = vand.u32 3, %v1650_v49  ;;  %vm1653_vm1 = vweird.f32 %v4587_v32  ;;  %vm2557_vm9 = vcmask 588800  }
 0x783   : >> { %3106 = vmatpush3.bf16.xpose.msra.mxu1 %v3105_v60  ;;  %v1645_v33 = vxor.u32 2147483648, %v1644_v46  ;;  %v3090_v56 = vpack.c.bf16 %v2376_v40, %v2375_v61  ;;  %v1862_v25 = vand.u32 3, %v1861_v47  ;;  %v2377_v50 = vadd.f32 %v2368_v29, %v2359_v62  ;;  %v3396_v47 = vld [vmem:[%s1446_s14] ss:$8 sm:$0x3]  ;;  %s2679_s14 = scalar_lea.sflag (%p1435_p2), [#allocation6], %s4305_s24 }
 0x784   : >> { %3078 = vmatprep.subr.mxu1 %v5109_v22  ;;  %v2378_v31 = vadd.f32 %v2369_v59, %v2360_v21  ;;  %vm1659_vm3 = vcmp.eq.s32.totalorder %v1654_v57, 2  ;;  %vm1656_vm5 = vcmp.eq.s32.totalorder %v1654_v57, 0  ;;  %vm1655_vm7 = vcmp.lt.s32.totalorder %v1654_v57, 2 }
 0x785   : >> { %v1646_v20 = vsel %vm1563_vm0, %v1645_v33, %v1644_v46  ;;  %vm1867_vm4 = vcmp.eq.s32.totalorder %v1862_v25, 2  ;;  %vm1864_vm6 = vcmp.eq.s32.totalorder %v1862_v25, 0  ;;  %vm1863_vm8 = vcmp.lt.s32.totalorder %v1862_v25, 2 }
 0x786   : >> { %v1649_v54 = vsel %vm1562_vm2, %v4587_v32, %v1646_v20  ;;  %v3093_v0 = vpack.c.bf16 %v2378_v31, %v2377_v50  ;;  %v5110_v62 = vsub.s32 1, %v4540_v48  ;;  %v5111_v31 = vlaneseq }
 0x787   : >> { %3392 = vcosq.f32 %v1649_v54  ;;  %3088 = vmatpush3.bf16.xpose.msra.mxu0 %v3087_v43  ;;  %vm2603_vm11 = vcmask (%p1435_p2), 130048   ;;  %v3120_v4 = vpack.c.bf16 (%p1435_p2), %v2594_v3, %v2593_v2  ;;  %v3123_v7 = vpack.c.bf16 (%p1435_p2), %v2596_v6, %v2595_v5 }
 0x788   : >> { %3394 = vsinq.f32 %v1649_v54  ;;  %3089 = vmatprep.subr.bf16.mxu0 %v5106_v23  ;;  %vm2578_vm10 = vcmp.lt.s32.totalorder %v5111_v31, 144  ;;  %v3129_v13 = vpack.c.bf16 (%p1435_p2), %v2600_v12, %v2599_v11  ;;  %v3132_v16 = vpack.c.bf16 (%p1435_p2), %v2602_v15, %v2601_v14 }
 0x78f   : >> { %3091 = vmatpush3.bf16.xpose.msra.mxu0 %v3090_v56  ;;  %v2384_v56 = vrot.slane %v3396_v47, %v5110_v62 }
 0x790   : >> { %3092 = vmatprep.subr.bf16.mxu0 %v5106_v23 }
 0x791   : >> { %v3393_v38 = vpop.eup %3392 }
 0x792   : >> { %v3395_v41 = vpop.eup %3394  ;;  %v1660_v52 = vxor.u32 2147483648, %v3393_v38 }
 0x793   : >> { %v1657_v51 = vxor.u32 2147483648, %v3395_v41 }
 0x794   : >> { %v1661_v35 = vsel %vm1659_vm3, %v1660_v52, %v3395_v41  ;;  %v1869_v53 = vsel %vm1867_vm4, %v1660_v52, %v3395_v41  ;;  %v2585_v41 = vld [vmem:[#allocation22] sm:$0xff] (%p1435_p2)  ;;  %v2586_v52 = vld [vmem:[#allocation22 + $0x8] sm:$0xff] (%p1435_p2) }
 0x795   : >> { %v1658_v36 = vsel %vm1656_vm5, %v3393_v38, %v1657_v51  ;;  %v1866_v26 = vsel %vm1864_vm6, %v3393_v38, %v1657_v51  ;;  %v2587_v51 = vld [vmem:[#allocation22 + $0x10] sm:$0xff] (%p1435_p2) }
 0x796   : >> { %v1662_v39 = vsel %vm1655_vm7, %v1658_v36, %v1661_v35  ;;  %v1870_v60 = vsel %vm1863_vm8, %v1866_v26, %v1869_v53  ;;  %v3108_v35 = vpack.c.bf16 (%p1435_p2), %v2586_v52, %v2585_v41  ;;  %v2588_v53 = vld [vmem:[#allocation22 + $0x18] sm:$0xff] (%p1435_p2)  ;;  %v2589_v26 = vld [vmem:[#allocation22 + $0x20] sm:$0xff] (%p1435_p2) }
 0x797   : >> { %v1663_v23 = vsel %vm1653_vm1, nan, %v1662_v39  ;;  %v1871_v55 = vsel %vm1653_vm1, nan, %v1870_v60  ;;  %3094 = vmatpush3.bf16.xpose.msra.mxu0 %v3093_v0  ;;  %v3871_v0 = vmov (%p1435_p2), 0.0|0.0   ;;  %v3111_v36 = vpack.c.bf16 (%p1435_p2), %v2588_v53, %v2587_v51 }
 0x798   : >> { %v2136_v34 = vrot.slane %v1663_v23, %v4766_v58  ;;  %v2255_v63 = vrot.slane %v1871_v55, %v4766_v58  ;;  %3057 = vmatprep.subr.mxu0 %v5109_v22  ;;  %v2591_v23 = vld [vmem:[#allocation22 + $0x30] sm:$0xff] (%p1435_p2)  ;;  %v2592_v55 = vld [vmem:[#allocation22 + $0x38] sm:$0xff] (%p1435_p2) }
 0x799   : > { %v3117_v1 = vpack.c.bf16 (%p1435_p2), %v2592_v55, %v2591_v23 }
 0x79a   : >> { %v2143_v46 = vrot.slane %v2136_v34, %v4766_v58  ;;  %v2262_v32 = vrot.slane %v2255_v63, %v4766_v58 }
 0x79c   : >> { %v2179_v19 = vrot.slane %v2143_v46, %v4551_v45  ;;  %v2298_v44 = vrot.slane %v2262_v32, %v4551_v45 }
 0x79e   : >> { %v2197_v27 = vmul.f32 %v2179_v19, %v4795_v42  ;;  %v2316_v28 = vmul.f32 %v2298_v44, %v4799_v30  ;;  %v2334_v33 = vmul.f32 %v2298_v44, %v4795_v42  ;;  %v2343_v43 = vmul.f32 %v2179_v19, %v4799_v30 }
 0x7a0   : >> { %v2325_v37 = vsub.f32 %v2197_v27, %v2316_v28  ;;  %v2352_v24 = vadd.f32 %v2343_v43, %v2334_v33 }
 0x7a2   : >> { %v2464_v22 = vmul.f32 %v2325_v37, %v4381_v18  ;;  %v2473_v20 = vmul.f32 %v2352_v24, %v4363_v9  ;;  %v2361_v54 = vmul.f32 %v2325_v37, %v4363_v9  ;;  %v2370_v49 = vmul.f32 %v2352_v24, %v4381_v18  ;;  %v2598_v9 = vld [vmem:[#allocation22 + $0x68] sm:$0xff] (%p1435_p2) }
 0x7a3   : > { %v3126_v10 = vpack.c.bf16 (%p1435_p2), %v2598_v9, %v2597_v8 }
 0x7a4   : >> { %v2482_v61 = vsub.f32 %v2464_v22, %v2473_v20  ;;  %v2379_v40 = vadd.f32 %v2370_v49, %v2361_v54 }
 0x7a6   : >> { %3079 = vmatpush3.xpose.msra.mxu1 %v2482_v61  ;;  %3058 = vmatpush3.xpose.msra.mxu0 %v2379_v40 }
 0x7a7   : > { %3107 = vmatprep.subr.bf16.mxu0 (%p1435_p2), %v3871_v0 }
 0x7a9   : >> { %3081 = vmatmul.mubr.f32.vlgmr.msra.gmra.mrb[0].mxu1 %v2384_v56  ;;  %3060 = vmatmul.mubr.f32.vlgmr.msra.gmra.mrb[0].mxu0 %v2384_v56 }
 0x7aa   : > { %3109 = vmatpush1.bf16.msra.mxu0 (%p1435_p2), %v3108_v35 }
 0x7ab   : > { %3110 = vmatprep.subr.bf16.mxu0 (%p1435_p2), %v3871_v0 }
 0x7ae   : > { %3112 = vmatpush1.bf16.msra.mxu0 (%p1435_p2), %v3111_v36 }
 0x7af   : > { %3113 = vmatprep.subr.bf16.mxu0 (%p1435_p2), %v3871_v0 }
 0x87c   : >> { %v2549_v42 = vpop.f32.mrb[0].mxu1  ;;  %v2452_v30 = vpop.f32.mrb[0].mxu0 }
 0x87d   : >> { %v3082_v21 = vpop.f32.mrb[1].mxu1  ;;  %2554 = vrot.lane.b32.xlu0 %v2549_v42, %s3870_s22  ;;  %v3061_v29 = vpop.f32.mrb[1].mxu0  ;;  %s3735_s22 = scalar_lea.vmem (%p1435_p2), %s4988_s23, 128 }
 0x87e   : > { %p3736_p3 = scmp.ne.s32.totalorder (%p1435_p2), %s4988_s23, %s3735_s22 }
 0x880   : > { %p3737_p10 = pnand (%p1435_p2), %p3736_p3, %p5114_p6 }
 0x882   : > { %p3738_p11 = pneg (%p1435_p2), %p3737_p10 }
 0x8ef   : >> { %v2555_v59 = vpop.permute.xlu0 %2554 }
 0x8f0   : >> { %v2558_v57 = vsel %vm2557_vm9, %v2452_v30, %v2555_v59 }
 0x8f1   : >> { %v2560_v25 = vcombine.low %v2558_v57, %v2555_v59  ;;  %1437 = sbr.rel (!%p1435_p2) target bundleno = 1784 (0x6f8), region = 174 }
 0x8f3   : >> { %v2567_v50 = vrot.slane %v2560_v25, %v4766_v58 }
 0x8f5   : >> { %v2574_v38 = vrot.slane %v2567_v50, %v4766_v58  ;;  %v2590_v58 = vld [vmem:[#allocation22 + $0x28] sm:$0xff] (%p1435_p2) }
 0x8f6   : > { %v3114_v60 = vpack.c.bf16 (%p1435_p2), %v2590_v58, %v2589_v26 }
 0x8f7   : >> { %2581 = vst.msk [vmem:[%s2580_s10] ss:$8 sm:$0x3] %vm2578_vm10, %v2574_v38  ;;  %s3872_s10 = smov (%p1435_p2), [#allocation24]  }
 0x8f8   : > { %3115 = vmatpush1.bf16.msra.mxu0 %v3114_v60  ;;  %s3739_s0 = sshll.u32 %s3872_s10, 4  ;;  %s3740_s0 = int_to_ptr.vmem [resolvable:$false] %s3739_s0 }
 0x8f9   : > { %3116 = vmatprep.subr.bf16.mxu0 %v3871_v0  ;;  %s3741_s25 = scalar_lea.vmem %s3740_s0, 256  ;;  %p3742_p8 = scmp.lt.s32.totalorder %s4988_s23, %s3740_s0 }
 0x8fa   : > { %p3743_p5 = scmp.lt.s32.totalorder %s3741_s25, %s3735_s22 }
 0x8fc   : > { %3118 = vmatpush1.bf16.msra.mxu0 %v3117_v1  ;;  %p3744_p9 = por %p3743_p5, %p3742_p8 }
 0x8fd   : > { %3119 = vmatprep.subr.bf16.mxu0 %v3871_v0 }
 0x8fe   : > { %v2584_v39 = vld [vmem:[#allocation3 + $0x8] sm:$0xff]  ;;  %v2583_v17 = vld [vmem:[#allocation3] sm:$0xff]  ;;  %p3745_p7 = pnand %p3744_p9, %p3738_p11 }
 0x8ff   : > { %2971 = vmatprep.mubr.msk.f32.mxu0 %vm2603_vm11, %v2584_v39 }
 0x900   : > { %3121 = vmatpush1.bf16.msra.mxu0 %v3120_v4 }
 0x901   : > { %3122 = vmatprep.subr.bf16.mxu0 %v3871_v0 }
 0x904   : > { %3124 = vmatpush1.bf16.msra.mxu0 %v3123_v7 }
 0x905   : > { %3125 = vmatprep.subr.bf16.mxu0 %v3871_v0 }
 0x908   : > { %3127 = vmatpush1.bf16.msra.mxu0 %v3126_v10 }
 0x909   : > { %3128 = vmatprep.subr.bf16.mxu0 %v3871_v0 }
 0x90c   : > { %3130 = vmatpush1.bf16.msra.mxu0 %v3129_v13 }
 0x90d   : > { %3131 = vmatprep.subr.bf16.mxu0 %v3871_v0 }
 0x910   : > { %3133 = vmatpush1.bf16.msra.mxu0 %v3132_v16 }
 0x913   : > { %2672 = vmatmul.mubr.f32.vlgmr.msra.gmra.mrb[0].mxu0 %v2583_v17 }
 0x9e6   : > { %v2673_v18 = vpop.f32.mrb[0].mxu0 }
 0x9e7   : > { %2677 = vst [vmem:[%s4562_s1] sm:$0xff] %v2673_v18  ;;  %v2675_v48 = vpop.f32.mrb[1].mxu0 }
 0x9e8   : > { %3748 = shalt.err (!%p3745_p7)
}
 0x9e9   : > { %s3749_s24 = scalar_lea.hbm %s4986_s20, 128  ;;  %s3753_s27 = scalar_lea.hbm %s5113_s17, 256 }
 0x9ea   : > { %p3750_p4 = scmp.ne.s32.totalorder %s4986_s20, %s3749_s24  ;;  %p3754_p13 = scmp.lt.u32.totalorder %s4986_s20, %s5113_s17 }
 0x9eb   : > { %p3755_p0 = scmp.lt.u32.totalorder %s3753_s27, %s3749_s24  ;;  %p3757_p3 = scmp.lt.u32.totalorder %s3749_s24, %s4986_s20 }
 0x9ec   : > { %p3751_p12 = pnand %p3750_p4, %p5114_p6 }
 0x9ed   : > { %p3756_p2 = por %p3755_p0, %p3754_p13 }
 0x9ee   : > { %p3752_p1 = pneg %p3751_p12 }
 0x9ef   : > { %p3758_p10 = por %p3757_p3, %p3756_p2 }
 0x9f1   : > { %p3759_p11 = pnand %p3758_p10, %p3752_p1 }
 0x9f3   : > { %3762 = shalt.err (!%p3759_p11)
}
 0x9f4   : > { %3208 = dma.vmem_to_hbm [thread:$0]  (%p5114_p6), %s4988_s23, 128, %s4986_s20, %s2679_s14  }
 0x9f5 PF: > { %s2704_s22 = sand.u32 1, %s3817_s29   ;;  %p5115_p8 = scmp.ne.s32.totalorder %s5081_s28, 0 }
 0x9f6   : > { %p5116_p5 = scmp.ge.s32.totalorder %s3829_s16, 2  ;;  %s2705_s25 = scalar_lea.sflag [#allocation6], %s2704_s22 }
 0x9f8   : > { %p3249_p9 = pnand %p5116_p5, %p5115_p8 }
 0x9fa   : > { %3812 = dma.done.wait (!%p3249_p9), %s2705_s25, 128  }
 0x9fb   : > { %3814 = vsyncadd (!%p3249_p9), %s2705_s25, 4294967168  ;;  %p33_p7 = scmp.ge.s32.totalorder %s4235_s9, 4   ;;  %s5117_s29 = smov %s3821_s30 }
 0x9fc   : > { %s5118_s30 = smov %s3825_s15  ;;  %s5119_s15 = smov %s4247_s19 }
 0x9fd   : > { %s5120_s16 = smov %s4235_s9  ;;  %35 = sbr.rel (!%p33_p7) target bundleno = 18 (0x12), region = 185 }
 0xa04   :  { %2710 = vsyncpa [#allocation5], 1 }
 0xa05   :  { %2712 = vsyncpa [#allocation5 + $0x1], 1 }
 0xa06   :  { %2713 = vsyncpa [#allocation8], 1 }
 0xa07   :  { %2714 = vsyncpa [#allocation11], 1 }
 0xa08   :  { %2715 = vsyncpa [#allocation14], 1 }
 0xa09   :  { %2716 = vsyncpa [#allocation17], 1 }
 0xa0a   :  { %2717 = vsyncpa [#allocation20], 1 }
 0xa0b   :  { %2718 = vsyncpa [#allocation23], 1 }
 0xa0c   :  { %2719 = vsyncpa [#allocation6], 1 }
 0xa0d   :  { %2721 = vsyncpa [#allocation6 + $0x1], 1 }

</bundles_post_ra>
